<compile_context>
chip_gen: v6e
topology: v6e:2x2x1
jax: 0.10.0
libtpu: 0.0.40
codegen_flags: <defaults>
</compile_context>

<pallas_src>
import numpy as np
import jax
import jax.numpy as jnp
from jax.experimental import pallas as pl
from jax.experimental.pallas import tpu as pltpu


# ---------------------------------------------------------------------------
# Fused kernel: one batch element per grid step, channel-major layout.
# ---------------------------------------------------------------------------
def _fusion_kernel(f0_ref, f1_ref,
                   wup_ref, su_ref, bu_ref, mt_ref,
                   sel_ref, wdw_ref, sd_ref, bd_ref,
                   wpw_ref, sp_ref, bp_ref,
                   x1_ref, x2_ref):
    C0, HW = f0_ref.shape[1], f0_ref.shape[2]
    hw2 = sel_ref.shape[2]

    f0 = f0_ref[0]                     # (C0, H*W)  f32, lane-dense (256 lanes)
    f1 = f1_ref[0]                     # (C1, h*w)  f32

    # ---- x1 = feats0 + bilinear_up2x(relu(bn(conv1x1(feats1)))) -----------------
    z = jnp.dot(wup_ref[...], f1.astype(jnp.bfloat16),
                preferred_element_type=jnp.float32)           # (C0, h*w)
    z = jnp.maximum(z * su_ref[...] + bu_ref[...], 0.0)
    up = jnp.dot(z.astype(jnp.bfloat16), mt_ref[...],
                 preferred_element_type=jnp.float32)          # (C0, H*W)
    x1_ref[0] = (up + f0).astype(x1_ref.dtype)

    # ---- x2 = relu(bn(conv1x1(relu(bn(dwconv3x3_s2(feats0)))))) + feats1 --------
    f0b = f0.astype(jnp.bfloat16)
    acc = jnp.zeros((C0, hw2), jnp.float32)
    for k in range(9):                 # static unroll; each tap is one MXU "gather"
        tap = jnp.dot(f0b, sel_ref[k], preferred_element_type=jnp.float32)  # (C0, Ho*Wo)
        acc = acc + tap * wdw_ref[k]   # per-channel depthwise weight, broadcast on lanes
    y = jnp.maximum(acc * sd_ref[...] + bd_ref[...], 0.0)     # (C0, Ho*Wo)
    z2 = jnp.dot(wpw_ref[...], y.astype(jnp.bfloat16),
                 preferred_element_type=jnp.float32)          # (C1, Ho*Wo)
    z2 = jnp.maximum(z2 * sp_ref[...] + bp_ref[...], 0.0)
    x2_ref[0] = (z2 + f1).astype(x2_ref.dtype)


# ---------------------------------------------------------------------------
# Host-side constants (numpy, built once)
# ---------------------------------------------------------------------------
def _bilinear_matrix(n_in, n_out):
    """1-D interpolation matrix of nn.Upsample(mode='bilinear', align_corners=True)."""
    if n_in == 1:
        return np.ones((n_out, 1), np.float32)
    src = np.arange(n_out, dtype=np.float32) * float(n_in - 1) / float(n_out - 1)
    lo = np.clip(np.floor(src).astype(np.int64), 0, n_in - 2)
    frac = (src - lo).astype(np.float32)
    A = np.zeros((n_out, n_in), np.float32)
    rows = np.arange(n_out)
    A[rows, lo] += 1.0 - frac
    A[rows, lo + 1] += frac
    return A


def _dwconv_select_matrices(H, W):
    """0/1 matrices S[k] (H*W, Ho*Wo) selecting tap k of a 3x3 stride-2 conv, pad=1.
    Out-of-range taps stay zero, so the halo/padding is handled with no in-kernel logic."""
    Ho, Wo = H // 2, W // 2
    S = np.zeros((9, H * W, Ho * Wo), np.float32)
    for ky in range(3):
        for kx in range(3):
            k = 3 * ky + kx
            for ho in range(Ho):
                hi = 2 * ho + ky - 1
                if hi < 0 or hi >= H:
                    continue
                for wo in range(Wo):
                    wi = 2 * wo + kx - 1
                    if wi < 0 or wi >= W:
                        continue
                    S[k, hi * W + wi, ho * Wo + wo] = 1.0
    return S


# ---------------------------------------------------------------------------
# Parameters (synthetic, BN folded) and one-time kernel-layout preparation
# ---------------------------------------------------------------------------
def _fold_bn(key, c, eps=1e-5):
    k1, k2, k3, k4 = jax.random.split(key, 4)
    gamma = 1.0 + 0.1 * jax.random.normal(k1, (c,), jnp.float32)
    beta = 0.1 * jax.random.normal(k2, (c,), jnp.float32)
    mean = 0.1 * jax.random.normal(k3, (c,), jnp.float32)
    var = jax.random.uniform(k4, (c,), jnp.float32, minval=0.5, maxval=1.5)
    scale = gamma / jnp.sqrt(var + eps)
    bias = beta - mean * scale
    return scale[None, :], bias[None, :]


def init_params(key, base_ch=16):
    """Deterministic synthetic parameters (conv bias=False, eval-mode BN folded)."""
    C0, C1 = base_ch, 2 * base_ch
    ks = jax.random.split(key, 6)
    w_up = 0.1 * jax.random.normal(ks[0], (C1, C0), jnp.float32)   # UpsampleBlock 1x1 conv, (in, out)
    s_up, b_up = _fold_bn(ks[1], C0)
    w_dw = 0.1 * jax.random.normal(ks[2], (9, C0), jnp.float32)    # depthwise 3x3 taps, (ky*3+kx, C)
    s_dw, b_dw = _fold_bn(ks[3], C0)
    w_pw = 0.1 * jax.random.normal(ks[4], (C0, C1), jnp.float32)   # DSConv pointwise 1x1, (in, out)
    s_pw, b_pw = _fold_bn(ks[5], C1)
    return dict(w_up=w_up, s_up=s_up, b_up=b_up,
                w_dw=w_dw, s_dw=s_dw, b_dw=b_dw,
                w_pw=w_pw, s_pw=s_pw, b_pw=b_pw)


def prepare_fusion_inputs(params, feat_shapes):
    """One-time conversion of params + shape-only constants into the kernel's
    channel-major / bf16 layout (done outside the forward path)."""
    (_, C0, H, W), (_, C1, h, w) = feat_shapes
    M = np.kron(_bilinear_matrix(h, H), _bilinear_matrix(w, W))          # (H*W, h*w)
    return dict(
        w_up_t=jnp.asarray(params["w_up"].T, jnp.bfloat16),              # (C0, C1)
        s_up=params["s_up"].T, b_up=params["b_up"].T,                    # (C0, 1)
        m_t=jnp.asarray(M.T, jnp.bfloat16),                              # (h*w, H*W)
        sel=jnp.asarray(_dwconv_select_matrices(H, W), jnp.bfloat16),    # (9, H*W, Ho*Wo)
        w_dw=params["w_dw"][:, :, None],                                 # (9, C0, 1)
        s_dw=params["s_dw"].T, b_dw=params["b_dw"].T,                    # (C0, 1)
        w_pw_t=jnp.asarray(params["w_pw"].T, jnp.bfloat16),              # (C1, C0)
        s_pw=params["s_pw"].T, b_pw=params["b_pw"].T,                    # (C1, 1)
    )


# ---------------------------------------------------------------------------
# Forward: NCHW in / NCHW out, only free reshapes outside the single pallas_call
# ---------------------------------------------------------------------------
def fusion_block_forward(feats_nchw, kp):
    f0, f1 = feats_nchw
    N, C0, H, W = f0.shape
    _, C1, h, w = f1.shape
    Ho, Wo = H // 2, W // 2
    HW, hw, hw2 = H * W, h * w, Ho * Wo

    f0_cm = f0.reshape(N, C0, HW)     # free metadata reshape of NCHW (channel-major)
    f1_cm = f1.reshape(N, C1, hw)

    flops = 2 * N * (C0 * C1 * hw + C0 * hw * HW + 9 * C0 * HW * hw2 + C1 * C0 * hw2)
    bytes_accessed = (4 * (N * C0 * HW * 2 + N * C1 * hw + N * C1 * hw2)
                      + 2 * (int(kp["m_t"].size) + int(kp["sel"].size)
                             + int(kp["w_up_t"].size) + int(kp["w_pw_t"].size)))

    def batch_map(n):
        return (n, 0, 0)

    def const2(n):
        return (0, 0)

    def const3(n):
        return (0, 0, 0)

    x1_cm, x2_cm = pl.pallas_call(
        _fusion_kernel,
        grid=(N,),
        in_specs=[
            pl.BlockSpec((1, C0, HW), batch_map),     # f0 (lane-dense, read once)
            pl.BlockSpec((1, C1, hw), batch_map),     # f1
            pl.BlockSpec((C0, C1), const2),           # w_up^T           (bf16)
            pl.BlockSpec((C0, 1), const2),            # s_up
            pl.BlockSpec((C0, 1), const2),            # b_up
            pl.BlockSpec((hw, HW), const2),           # bilinear M^T     (bf16)
            pl.BlockSpec((9, HW, hw2), const3),       # dw-conv tap selection (bf16)
            pl.BlockSpec((9, C0, 1), const3),         # dw-conv per-channel weights
            pl.BlockSpec((C0, 1), const2),            # s_dw
            pl.BlockSpec((C0, 1), const2),            # b_dw
            pl.BlockSpec((C1, C0), const2),           # w_pw^T           (bf16)
            pl.BlockSpec((C1, 1), const2),            # s_pw
            pl.BlockSpec((C1, 1), const2),            # b_pw
        ],
        out_specs=[
            pl.BlockSpec((1, C0, HW), batch_map),     # x1, 256-lane dense stores
            pl.BlockSpec((1, C1, hw2), batch_map),    # x2
        ],
        out_shape=[
            jax.ShapeDtypeStruct((N, C0, HW), jnp.float32),
            jax.ShapeDtypeStruct((N, C1, hw2), jnp.float32),
        ],
        compiler_params=pltpu.CompilerParams(dimension_semantics=("parallel",)),
        cost_estimate=pl.CostEstimate(flops=flops, transcendentals=0,
                                      bytes_accessed=bytes_accessed),
    )(f0_cm, f1_cm, kp["w_up_t"], kp["s_up"], kp["b_up"], kp["m_t"],
      kp["sel"], kp["w_dw"], kp["s_dw"], kp["b_dw"],
      kp["w_pw_t"], kp["s_pw"], kp["b_pw"])

    # Free metadata reshapes back to NCHW.
    return [x1_cm.reshape(N, C0, H, W), x2_cm.reshape(N, C1, Ho, Wo)]


# ---------------------------------------------------------------------------
# Pure-JAX f32 reference (module semantics) for correctness checking
# ---------------------------------------------------------------------------
def _reference(feats_nchw, params):
    f0 = jnp.transpose(feats_nchw[0], (0, 2, 3, 1))
    f1 = jnp.transpose(feats_nchw[1], (0, 2, 3, 1))
    N, H, W, C0 = f0.shape
    _, h, w, C1 = f1.shape
    Ho, Wo = H // 2, W // 2
    M = jnp.asarray(np.kron(_bilinear_matrix(h, H), _bilinear_matrix(w, W)))
    z = jnp.maximum(f1.reshape(-1, C1) @ params["w_up"] * params["s_up"] + params["b_up"], 0.0)
    z = z.reshape(N, h * w, C0)
    up = jnp.einsum("pq,nqc->npc", M, z).reshape(N, H, W, C0)
    x1 = f0 + up
    xpad = jnp.pad(f0, ((0, 0), (1, 1), (1, 1), (0, 0)))
    acc = jnp.zeros((N, Ho, Wo, C0), jnp.float32)
    for ky in range(3):
        for kx in range(3):
            acc = acc + xpad[:, ky:ky + 2 * Ho:2, kx:kx + 2 * Wo:2, :] * params["w_dw"][3 * ky + kx]
    y = jnp.maximum(acc * params["s_dw"] + params["b_dw"], 0.0)
    zz = jnp.maximum(y.reshape(-1, C0) @ params["w_pw"] * params["s_pw"] + params["b_pw"], 0.0)
    x2 = zz.reshape(N, Ho, Wo, C1) + f1
    return [jnp.transpose(x1, (0, 3, 1, 2)), jnp.transpose(x2, (0, 3, 1, 2))]


if __name__ == "__main__":
    key = jax.random.PRNGKey(0)
    k_f0, k_f1, k_p = jax.random.split(key, 3)
    N, base_ch, H, W = 2, 16, 16, 16
    # feats (NCHW, PyTorch convention): stage-2 FusionBlock takes 2 resolutions.
    feats = [
        jax.random.normal(k_f0, (N, base_ch, H, W), jnp.float32),
        jax.random.normal(k_f1, (N, 2 * base_ch, H // 2, W // 2), jnp.float32),
    ]
    params = init_params(k_p, base_ch)
    kp = prepare_fusion_inputs(params, [feats[0].shape, feats[1].shape])

    outs = fusion_block_forward(feats, kp)
    outs = jax.block_until_ready(outs)

    refs = _reference(feats, params)
    for o, r in zip(outs, refs):
        assert o.shape == r.shape, (o.shape, r.shape)
        # Kernel uses bf16 MXU operands with f32 accumulation; compare loosely vs f32 ref.
        assert jnp.allclose(o, r, atol=5e-2, rtol=5e-2), float(jnp.max(jnp.abs(o - r)))

    print("KERNEL_OK")
</pallas_src>

<mosaic_0001>
module attributes {stable_mosaic.version = 11 : i64} {
  func.func @_fusion_kernel(%arg0: i32, %arg1: memref<1x16x256xf32, #tpu.memory_space<vmem>>, %arg2: memref<1x32x64xf32, #tpu.memory_space<vmem>>, %arg3: memref<16x32xbf16, #tpu.memory_space<vmem>>, %arg4: memref<16x1xf32, #tpu.memory_space<vmem>>, %arg5: memref<16x1xf32, #tpu.memory_space<vmem>>, %arg6: memref<64x256xbf16, #tpu.memory_space<vmem>>, %arg7: memref<9x256x64xbf16, #tpu.memory_space<vmem>>, %arg8: memref<9x16x1xf32, #tpu.memory_space<vmem>>, %arg9: memref<16x1xf32, #tpu.memory_space<vmem>>, %arg10: memref<16x1xf32, #tpu.memory_space<vmem>>, %arg11: memref<32x16xbf16, #tpu.memory_space<vmem>>, %arg12: memref<32x1xf32, #tpu.memory_space<vmem>>, %arg13: memref<32x1xf32, #tpu.memory_space<vmem>>, %arg14: memref<1x16x256xf32, #tpu.memory_space<vmem>>, %arg15: memref<1x32x64xf32, #tpu.memory_space<vmem>>) attributes {dimension_semantics = [#tpu.dimension_semantics<parallel>], iteration_bounds = array<i64: 2>, scalar_prefetch = 0 : i64, scratch_operands = 0 : i64, tpu.core_type = #tpu.core_type<tc>, window_params = [{transform_indices = @transform_0, window_bounds = array<i64: 1, 16, 256>}, {transform_indices = @transform_1, window_bounds = array<i64: 1, 32, 64>}, {pipeline_mode = #tpu.pipeline_mode<synchronous>, transform_indices = @transform_2, window_bounds = array<i64: 16, 32>}, {pipeline_mode = #tpu.pipeline_mode<synchronous>, transform_indices = @transform_3, window_bounds = array<i64: 16, 1>}, {pipeline_mode = #tpu.pipeline_mode<synchronous>, transform_indices = @transform_4, window_bounds = array<i64: 16, 1>}, {pipeline_mode = #tpu.pipeline_mode<synchronous>, transform_indices = @transform_5, window_bounds = array<i64: 64, 256>}, {pipeline_mode = #tpu.pipeline_mode<synchronous>, transform_indices = @transform_6, window_bounds = array<i64: 9, 256, 64>}, {pipeline_mode = #tpu.pipeline_mode<synchronous>, transform_indices = @transform_7, window_bounds = array<i64: 9, 16, 1>}, {pipeline_mode = #tpu.pipeline_mode<synchronous>, transform_indices = @transform_8, window_bounds = array<i64: 16, 1>}, {pipeline_mode = #tpu.pipeline_mode<synchronous>, transform_indices = @transform_9, window_bounds = array<i64: 16, 1>}, {pipeline_mode = #tpu.pipeline_mode<synchronous>, transform_indices = @transform_10, window_bounds = array<i64: 32, 16>}, {pipeline_mode = #tpu.pipeline_mode<synchronous>, transform_indices = @transform_11, window_bounds = array<i64: 32, 1>}, {pipeline_mode = #tpu.pipeline_mode<synchronous>, transform_indices = @transform_12, window_bounds = array<i64: 32, 1>}, {transform_indices = @transform_13, window_bounds = array<i64: 1, 16, 256>}, {transform_indices = @transform_14, window_bounds = array<i64: 1, 32, 64>}]} {
    %c0 = arith.constant 0 : index
    %c0_0 = arith.constant 0 : index
    %c0_1 = arith.constant 0 : index
    %0 = vector.load %arg1[%c0, %c0_0, %c0_1] : memref<1x16x256xf32, #tpu.memory_space<vmem>>, vector<1x16x256xf32>
    %1 = vector.shape_cast %0 : vector<1x16x256xf32> to vector<16x256xf32>
    %c0_2 = arith.constant 0 : index
    %c0_3 = arith.constant 0 : index
    %c0_4 = arith.constant 0 : index
    %2 = vector.load %arg2[%c0_2, %c0_3, %c0_4] : memref<1x32x64xf32, #tpu.memory_space<vmem>>, vector<1x32x64xf32>
    %3 = vector.shape_cast %2 : vector<1x32x64xf32> to vector<32x64xf32>
    %c0_5 = arith.constant 0 : index
    %c0_6 = arith.constant 0 : index
    %4 = vector.load %arg3[%c0_5, %c0_6] : memref<16x32xbf16, #tpu.memory_space<vmem>>, vector<16x32xbf16>
    %5 = arith.truncf %3 : vector<32x64xf32> to vector<32x64xbf16>
    %cst = arith.constant dense<0.000000e+00> : vector<16x64xf32>
    %6 = tpu.matmul %4, %5, %cst {dimension_numbers = #tpu.dot_dimension_numbers<[1], [0], [0], [1], [0, 0, 1, 1], [], []>} : vector<16x32xbf16>, vector<32x64xbf16>, vector<16x64xf32> -> vector<16x64xf32>
    %c0_7 = arith.constant 0 : index
    %c0_8 = arith.constant 0 : index
    %7 = vector.load %arg4[%c0_7, %c0_8] : memref<16x1xf32, #tpu.memory_space<vmem>>, vector<16x1xf32>
    %8 = vector.broadcast %7 : vector<16x1xf32> to vector<16x64xf32>
    %9 = arith.mulf %6, %8 : vector<16x64xf32>
    %c0_9 = arith.constant 0 : index
    %c0_10 = arith.constant 0 : index
    %10 = vector.load %arg5[%c0_9, %c0_10] : memref<16x1xf32, #tpu.memory_space<vmem>>, vector<16x1xf32>
    %11 = vector.broadcast %10 : vector<16x1xf32> to vector<16x64xf32>
    %12 = arith.addf %9, %11 : vector<16x64xf32>
    %cst_11 = arith.constant 0.000000e+00 : f32
    %13 = vector.broadcast %cst_11 : f32 to vector<16x64xf32>
    %14 = arith.maximumf %12, %13 : vector<16x64xf32>
    %15 = arith.truncf %14 : vector<16x64xf32> to vector<16x64xbf16>
    %c0_12 = arith.constant 0 : index
    %c0_13 = arith.constant 0 : index
    %16 = vector.load %arg6[%c0_12, %c0_13] : memref<64x256xbf16, #tpu.memory_space<vmem>>, vector<64x256xbf16>
    %cst_14 = arith.constant dense<0.000000e+00> : vector<16x256xf32>
    %17 = tpu.matmul %15, %16, %cst_14 {dimension_numbers = #tpu.dot_dimension_numbers<[1], [0], [0], [1], [0, 0, 1, 1], [], []>} : vector<16x64xbf16>, vector<64x256xbf16>, vector<16x256xf32> -> vector<16x256xf32>
    %18 = arith.addf %17, %1 : vector<16x256xf32>
    %c0_15 = arith.constant 0 : index
    %c0_16 = arith.constant 0 : index
    %c0_17 = arith.constant 0 : index
    %19 = vector.load %arg14[%c0_15, %c0_16, %c0_17] : memref<1x16x256xf32, #tpu.memory_space<vmem>>, vector<1x16x256xf32>
    %20 = vector.shape_cast %19 : vector<1x16x256xf32> to vector<16x256xf32>
    %21 = vector.shape_cast %18 : vector<16x256xf32> to vector<1x16x256xf32>
    tpu.vector_store %arg14[%c0_15, %c0_16, %c0_17], %21 {strides = array<i32>} : memref<1x16x256xf32, #tpu.memory_space<vmem>>, vector<1x16x256xf32>,
    %22 = arith.truncf %1 : vector<16x256xf32> to vector<16x256xbf16>
    %cst_18 = arith.constant 0.000000e+00 : f32
    %23 = vector.broadcast %cst_18 : f32 to vector<16x64xf32>
    %c0_19 = arith.constant 0 : index
    %c0_20 = arith.constant 0 : index
    %c0_21 = arith.constant 0 : index
    %24 = vector.load %arg7[%c0_19, %c0_20, %c0_21] : memref<9x256x64xbf16, #tpu.memory_space<vmem>>, vector<1x256x64xbf16>
    %25 = vector.shape_cast %24 : vector<1x256x64xbf16> to vector<256x64xbf16>
    %cst_22 = arith.constant dense<0.000000e+00> : vector<16x64xf32>
    %26 = tpu.matmul %22, %25, %cst_22 {dimension_numbers = #tpu.dot_dimension_numbers<[1], [0], [0], [1], [0, 0, 1, 1], [], []>} : vector<16x256xbf16>, vector<256x64xbf16>, vector<16x64xf32> -> vector<16x64xf32>
    %c0_23 = arith.constant 0 : index
    %c0_24 = arith.constant 0 : index
    %c0_25 = arith.constant 0 : index
    %27 = vector.load %arg8[%c0_23, %c0_24, %c0_25] : memref<9x16x1xf32, #tpu.memory_space<vmem>>, vector<1x16x1xf32>
    %28 = vector.shape_cast %27 : vector<1x16x1xf32> to vector<16x1xf32>
    %29 = vector.broadcast %28 : vector<16x1xf32> to vector<16x64xf32>
    %30 = arith.mulf %26, %29 : vector<16x64xf32>
    %31 = arith.addf %23, %30 : vector<16x64xf32>
    %c1 = arith.constant 1 : index
    %c0_26 = arith.constant 0 : index
    %c0_27 = arith.constant 0 : index
    %32 = vector.load %arg7[%c1, %c0_26, %c0_27] : memref<9x256x64xbf16, #tpu.memory_space<vmem>>, vector<1x256x64xbf16>
    %33 = vector.shape_cast %32 : vector<1x256x64xbf16> to vector<256x64xbf16>
    %cst_28 = arith.constant dense<0.000000e+00> : vector<16x64xf32>
    %34 = tpu.matmul %22, %33, %cst_28 {dimension_numbers = #tpu.dot_dimension_numbers<[1], [0], [0], [1], [0, 0, 1, 1], [], []>} : vector<16x256xbf16>, vector<256x64xbf16>, vector<16x64xf32> -> vector<16x64xf32>
    %c1_29 = arith.constant 1 : index
    %c0_30 = arith.constant 0 : index
    %c0_31 = arith.constant 0 : index
    %35 = vector.load %arg8[%c1_29, %c0_30, %c0_31] : memref<9x16x1xf32, #tpu.memory_space<vmem>>, vector<1x16x1xf32>
    %36 = vector.shape_cast %35 : vector<1x16x1xf32> to vector<16x1xf32>
    %37 = vector.broadcast %36 : vector<16x1xf32> to vector<16x64xf32>
    %38 = arith.mulf %34, %37 : vector<16x64xf32>
    %39 = arith.addf %31, %38 : vector<16x64xf32>
    %c2 = arith.constant 2 : index
    %c0_32 = arith.constant 0 : index
    %c0_33 = arith.constant 0 : index
    %40 = vector.load %arg7[%c2, %c0_32, %c0_33] : memref<9x256x64xbf16, #tpu.memory_space<vmem>>, vector<1x256x64xbf16>
    %41 = vector.shape_cast %40 : vector<1x256x64xbf16> to vector<256x64xbf16>
    %cst_34 = arith.constant dense<0.000000e+00> : vector<16x64xf32>
    %42 = tpu.matmul %22, %41, %cst_34 {dimension_numbers = #tpu.dot_dimension_numbers<[1], [0], [0], [1], [0, 0, 1, 1], [], []>} : vector<16x256xbf16>, vector<256x64xbf16>, vector<16x64xf32> -> vector<16x64xf32>
    %c2_35 = arith.constant 2 : index
    %c0_36 = arith.constant 0 : index
    %c0_37 = arith.constant 0 : index
    %43 = vector.load %arg8[%c2_35, %c0_36, %c0_37] : memref<9x16x1xf32, #tpu.memory_space<vmem>>, vector<1x16x1xf32>
    %44 = vector.shape_cast %43 : vector<1x16x1xf32> to vector<16x1xf32>
    %45 = vector.broadcast %44 : vector<16x1xf32> to vector<16x64xf32>
    %46 = arith.mulf %42, %45 : vector<16x64xf32>
    %47 = arith.addf %39, %46 : vector<16x64xf32>
    %c3 = arith.constant 3 : index
    %c0_38 = arith.constant 0 : index
    %c0_39 = arith.constant 0 : index
    %48 = vector.load %arg7[%c3, %c0_38, %c0_39] : memref<9x256x64xbf16, #tpu.memory_space<vmem>>, vector<1x256x64xbf16>
    %49 = vector.shape_cast %48 : vector<1x256x64xbf16> to vector<256x64xbf16>
    %cst_40 = arith.constant dense<0.000000e+00> : vector<16x64xf32>
    %50 = tpu.matmul %22, %49, %cst_40 {dimension_numbers = #tpu.dot_dimension_numbers<[1], [0], [0], [1], [0, 0, 1, 1], [], []>} : vector<16x256xbf16>, vector<256x64xbf16>, vector<16x64xf32> -> vector<16x64xf32>
    %c3_41 = arith.constant 3 : index
    %c0_42 = arith.constant 0 : index
    %c0_43 = arith.constant 0 : index
    %51 = vector.load %arg8[%c3_41, %c0_42, %c0_43] : memref<9x16x1xf32, #tpu.memory_space<vmem>>, vector<1x16x1xf32>
    %52 = vector.shape_cast %51 : vector<1x16x1xf32> to vector<16x1xf32>
    %53 = vector.broadcast %52 : vector<16x1xf32> to vector<16x64xf32>
    %54 = arith.mulf %50, %53 : vector<16x64xf32>
    %55 = arith.addf %47, %54 : vector<16x64xf32>
    %c4 = arith.constant 4 : index
    %c0_44 = arith.constant 0 : index
    %c0_45 = arith.constant 0 : index
    %56 = vector.load %arg7[%c4, %c0_44, %c0_45] : memref<9x256x64xbf16, #tpu.memory_space<vmem>>, vector<1x256x64xbf16>
    %57 = vector.shape_cast %56 : vector<1x256x64xbf16> to vector<256x64xbf16>
    %cst_46 = arith.constant dense<0.000000e+00> : vector<16x64xf32>
    %58 = tpu.matmul %22, %57, %cst_46 {dimension_numbers = #tpu.dot_dimension_numbers<[1], [0], [0], [1], [0, 0, 1, 1], [], []>} : vector<16x256xbf16>, vector<256x64xbf16>, vector<16x64xf32> -> vector<16x64xf32>
    %c4_47 = arith.constant 4 : index
    %c0_48 = arith.constant 0 : index
    %c0_49 = arith.constant 0 : index
    %59 = vector.load %arg8[%c4_47, %c0_48, %c0_49] : memref<9x16x1xf32, #tpu.memory_space<vmem>>, vector<1x16x1xf32>
    %60 = vector.shape_cast %59 : vector<1x16x1xf32> to vector<16x1xf32>
    %61 = vector.broadcast %60 : vector<16x1xf32> to vector<16x64xf32>
    %62 = arith.mulf %58, %61 : vector<16x64xf32>
    %63 = arith.addf %55, %62 : vector<16x64xf32>
    %c5 = arith.constant 5 : index
    %c0_50 = arith.constant 0 : index
    %c0_51 = arith.constant 0 : index
    %64 = vector.load %arg7[%c5, %c0_50, %c0_51] : memref<9x256x64xbf16, #tpu.memory_space<vmem>>, vector<1x256x64xbf16>
    %65 = vector.shape_cast %64 : vector<1x256x64xbf16> to vector<256x64xbf16>
    %cst_52 = arith.constant dense<0.000000e+00> : vector<16x64xf32>
    %66 = tpu.matmul %22, %65, %cst_52 {dimension_numbers = #tpu.dot_dimension_numbers<[1], [0], [0], [1], [0, 0, 1, 1], [], []>} : vector<16x256xbf16>, vector<256x64xbf16>, vector<16x64xf32> -> vector<16x64xf32>
    %c5_53 = arith.constant 5 : index
    %c0_54 = arith.constant 0 : index
    %c0_55 = arith.constant 0 : index
    %67 = vector.load %arg8[%c5_53, %c0_54, %c0_55] : memref<9x16x1xf32, #tpu.memory_space<vmem>>, vector<1x16x1xf32>
    %68 = vector.shape_cast %67 : vector<1x16x1xf32> to vector<16x1xf32>
    %69 = vector.broadcast %68 : vector<16x1xf32> to vector<16x64xf32>
    %70 = arith.mulf %66, %69 : vector<16x64xf32>
    %71 = arith.addf %63, %70 : vector<16x64xf32>
    %c6 = arith.constant 6 : index
    %c0_56 = arith.constant 0 : index
    %c0_57 = arith.constant 0 : index
    %72 = vector.load %arg7[%c6, %c0_56, %c0_57] : memref<9x256x64xbf16, #tpu.memory_space<vmem>>, vector<1x256x64xbf16>
    %73 = vector.shape_cast %72 : vector<1x256x64xbf16> to vector<256x64xbf16>
    %cst_58 = arith.constant dense<0.000000e+00> : vector<16x64xf32>
    %74 = tpu.matmul %22, %73, %cst_58 {dimension_numbers = #tpu.dot_dimension_numbers<[1], [0], [0], [1], [0, 0, 1, 1], [], []>} : vector<16x256xbf16>, vector<256x64xbf16>, vector<16x64xf32> -> vector<16x64xf32>
    %c6_59 = arith.constant 6 : index
    %c0_60 = arith.constant 0 : index
    %c0_61 = arith.constant 0 : index
    %75 = vector.load %arg8[%c6_59, %c0_60, %c0_61] : memref<9x16x1xf32, #tpu.memory_space<vmem>>, vector<1x16x1xf32>
    %76 = vector.shape_cast %75 : vector<1x16x1xf32> to vector<16x1xf32>
    %77 = vector.broadcast %76 : vector<16x1xf32> to vector<16x64xf32>
    %78 = arith.mulf %74, %77 : vector<16x64xf32>
    %79 = arith.addf %71, %78 : vector<16x64xf32>
    %c7 = arith.constant 7 : index
    %c0_62 = arith.constant 0 : index
    %c0_63 = arith.constant 0 : index
    %80 = vector.load %arg7[%c7, %c0_62, %c0_63] : memref<9x256x64xbf16, #tpu.memory_space<vmem>>, vector<1x256x64xbf16>
    %81 = vector.shape_cast %80 : vector<1x256x64xbf16> to vector<256x64xbf16>
    %cst_64 = arith.constant dense<0.000000e+00> : vector<16x64xf32>
    %82 = tpu.matmul %22, %81, %cst_64 {dimension_numbers = #tpu.dot_dimension_numbers<[1], [0], [0], [1], [0, 0, 1, 1], [], []>} : vector<16x256xbf16>, vector<256x64xbf16>, vector<16x64xf32> -> vector<16x64xf32>
    %c7_65 = arith.constant 7 : index
    %c0_66 = arith.constant 0 : index
    %c0_67 = arith.constant 0 : index
    %83 = vector.load %arg8[%c7_65, %c0_66, %c0_67] : memref<9x16x1xf32, #tpu.memory_space<vmem>>, vector<1x16x1xf32>
    %84 = vector.shape_cast %83 : vector<1x16x1xf32> to vector<16x1xf32>
    %85 = vector.broadcast %84 : vector<16x1xf32> to vector<16x64xf32>
    %86 = arith.mulf %82, %85 : vector<16x64xf32>
    %87 = arith.addf %79, %86 : vector<16x64xf32>
    %c8 = arith.constant 8 : index
    %c0_68 = arith.constant 0 : index
    %c0_69 = arith.constant 0 : index
    %88 = vector.load %arg7[%c8, %c0_68, %c0_69] : memref<9x256x64xbf16, #tpu.memory_space<vmem>>, vector<1x256x64xbf16>
    %89 = vector.shape_cast %88 : vector<1x256x64xbf16> to vector<256x64xbf16>
    %cst_70 = arith.constant dense<0.000000e+00> : vector<16x64xf32>
    %90 = tpu.matmul %22, %89, %cst_70 {dimension_numbers = #tpu.dot_dimension_numbers<[1], [0], [0], [1], [0, 0, 1, 1], [], []>} : vector<16x256xbf16>, vector<256x64xbf16>, vector<16x64xf32> -> vector<16x64xf32>
    %c8_71 = arith.constant 8 : index
    %c0_72 = arith.constant 0 : index
    %c0_73 = arith.constant 0 : index
    %91 = vector.load %arg8[%c8_71, %c0_72, %c0_73] : memref<9x16x1xf32, #tpu.memory_space<vmem>>, vector<1x16x1xf32>
    %92 = vector.shape_cast %91 : vector<1x16x1xf32> to vector<16x1xf32>
    %93 = vector.broadcast %92 : vector<16x1xf32> to vector<16x64xf32>
    %94 = arith.mulf %90, %93 : vector<16x64xf32>
    %95 = arith.addf %87, %94 : vector<16x64xf32>
    %c0_74 = arith.constant 0 : index
    %c0_75 = arith.constant 0 : index
    %96 = vector.load %arg9[%c0_74, %c0_75] : memref<16x1xf32, #tpu.memory_space<vmem>>, vector<16x1xf32>
    %97 = vector.broadcast %96 : vector<16x1xf32> to vector<16x64xf32>
    %98 = arith.mulf %95, %97 : vector<16x64xf32>
    %c0_76 = arith.constant 0 : index
    %c0_77 = arith.constant 0 : index
    %99 = vector.load %arg10[%c0_76, %c0_77] : memref<16x1xf32, #tpu.memory_space<vmem>>, vector<16x1xf32>
    %100 = vector.broadcast %99 : vector<16x1xf32> to vector<16x64xf32>
    %101 = arith.addf %98, %100 : vector<16x64xf32>
    %cst_78 = arith.constant 0.000000e+00 : f32
    %102 = vector.broadcast %cst_78 : f32 to vector<16x64xf32>
    %103 = arith.maximumf %101, %102 : vector<16x64xf32>
    %c0_79 = arith.constant 0 : index
    %c0_80 = arith.constant 0 : index
    %104 = vector.load %arg11[%c0_79, %c0_80] : memref<32x16xbf16, #tpu.memory_space<vmem>>, vector<32x16xbf16>
    %105 = arith.truncf %103 : vector<16x64xf32> to vector<16x64xbf16>
    %cst_81 = arith.constant dense<0.000000e+00> : vector<32x64xf32>
    %106 = tpu.matmul %104, %105, %cst_81 {dimension_numbers = #tpu.dot_dimension_numbers<[1], [0], [0], [1], [0, 0, 1, 1], [], []>} : vector<32x16xbf16>, vector<16x64xbf16>, vector<32x64xf32> -> vector<32x64xf32>
    %c0_82 = arith.constant 0 : index
    %c0_83 = arith.constant 0 : index
    %107 = vector.load %arg12[%c0_82, %c0_83] : memref<32x1xf32, #tpu.memory_space<vmem>>, vector<32x1xf32>
    %108 = vector.broadcast %107 : vector<32x1xf32> to vector<32x64xf32>
    %109 = arith.mulf %106, %108 : vector<32x64xf32>
    %c0_84 = arith.constant 0 : index
    %c0_85 = arith.constant 0 : index
    %110 = vector.load %arg13[%c0_84, %c0_85] : memref<32x1xf32, #tpu.memory_space<vmem>>, vector<32x1xf32>
    %111 = vector.broadcast %110 : vector<32x1xf32> to vector<32x64xf32>
    %112 = arith.addf %109, %111 : vector<32x64xf32>
    %cst_86 = arith.constant 0.000000e+00 : f32
    %113 = vector.broadcast %cst_86 : f32 to vector<32x64xf32>
    %114 = arith.maximumf %112, %113 : vector<32x64xf32>
    %115 = arith.addf %114, %3 : vector<32x64xf32>
    %c0_87 = arith.constant 0 : index
    %c0_88 = arith.constant 0 : index
    %c0_89 = arith.constant 0 : index
    %116 = vector.load %arg15[%c0_87, %c0_88, %c0_89] : memref<1x32x64xf32, #tpu.memory_space<vmem>>, vector<1x32x64xf32>
    %117 = vector.shape_cast %116 : vector<1x32x64xf32> to vector<32x64xf32>
    %118 = vector.shape_cast %115 : vector<32x64xf32> to vector<1x32x64xf32>
    tpu.vector_store %arg15[%c0_87, %c0_88, %c0_89], %118 {strides = array<i32>} : memref<1x32x64xf32, #tpu.memory_space<vmem>>, vector<1x32x64xf32>,
    return
  }
  func.func @transform_0(%arg0: i32) -> (i32, i32, i32) {
    %c0_i32 = arith.constant 0 : i32
    %c0_i32_0 = arith.constant 0 : i32
    %c0_i32_1 = arith.constant 0 : i32
    return %arg0, %c0_i32, %c0_i32_0 : i32, i32, i32
  }
  func.func @transform_1(%arg0: i32) -> (i32, i32, i32) {
    %c0_i32 = arith.constant 0 : i32
    %c0_i32_0 = arith.constant 0 : i32
    %c0_i32_1 = arith.constant 0 : i32
    return %arg0, %c0_i32, %c0_i32_0 : i32, i32, i32
  }
  func.func @transform_2(%arg0: i32) -> (i32, i32) {
    %c0_i32 = arith.constant 0 : i32
    %c0_i32_0 = arith.constant 0 : i32
    %c0_i32_1 = arith.constant 0 : i32
    return %c0_i32, %c0_i32_0 : i32, i32
  }
  func.func @transform_3(%arg0: i32) -> (i32, i32) {
    %c0_i32 = arith.constant 0 : i32
    %c0_i32_0 = arith.constant 0 : i32
    %c0_i32_1 = arith.constant 0 : i32
    return %c0_i32, %c0_i32_0 : i32, i32
  }
  func.func @transform_4(%arg0: i32) -> (i32, i32) {
    %c0_i32 = arith.constant 0 : i32
    %c0_i32_0 = arith.constant 0 : i32
    %c0_i32_1 = arith.constant 0 : i32
    return %c0_i32, %c0_i32_0 : i32, i32
  }
  func.func @transform_5(%arg0: i32) -> (i32, i32) {
    %c0_i32 = arith.constant 0 : i32
    %c0_i32_0 = arith.constant 0 : i32
    %c0_i32_1 = arith.constant 0 : i32
    return %c0_i32, %c0_i32_0 : i32, i32
  }
  func.func @transform_6(%arg0: i32) -> (i32, i32, i32) {
    %c0_i32 = arith.constant 0 : i32
    %c0_i32_0 = arith.constant 0 : i32
    %c0_i32_1 = arith.constant 0 : i32
    %c0_i32_2 = arith.constant 0 : i32
    return %c0_i32, %c0_i32_0, %c0_i32_1 : i32, i32, i32
  }
  func.func @transform_7(%arg0: i32) -> (i32, i32, i32) {
    %c0_i32 = arith.constant 0 : i32
    %c0_i32_0 = arith.constant 0 : i32
    %c0_i32_1 = arith.constant 0 : i32
    %c0_i32_2 = arith.constant 0 : i32
    return %c0_i32, %c0_i32_0, %c0_i32_1 : i32, i32, i32
  }
  func.func @transform_8(%arg0: i32) -> (i32, i32) {
    %c0_i32 = arith.constant 0 : i32
    %c0_i32_0 = arith.constant 0 : i32
    %c0_i32_1 = arith.constant 0 : i32
    return %c0_i32, %c0_i32_0 : i32, i32
  }
  func.func @transform_9(%arg0: i32) -> (i32, i32) {
    %c0_i32 = arith.constant 0 : i32
    %c0_i32_0 = arith.constant 0 : i32
    %c0_i32_1 = arith.constant 0 : i32
    return %c0_i32, %c0_i32_0 : i32, i32
  }
  func.func @transform_10(%arg0: i32) -> (i32, i32) {
    %c0_i32 = arith.constant 0 : i32
    %c0_i32_0 = arith.constant 0 : i32
    %c0_i32_1 = arith.constant 0 : i32
    return %c0_i32, %c0_i32_0 : i32, i32
  }
  func.func @transform_11(%arg0: i32) -> (i32, i32) {
    %c0_i32 = arith.constant 0 : i32
    %c0_i32_0 = arith.constant 0 : i32
    %c0_i32_1 = arith.constant 0 : i32
    return %c0_i32, %c0_i32_0 : i32, i32
  }
  func.func @transform_12(%arg0: i32) -> (i32, i32) {
    %c0_i32 = arith.constant 0 : i32
    %c0_i32_0 = arith.constant 0 : i32
    %c0_i32_1 = arith.constant 0 : i32
    return %c0_i32, %c0_i32_0 : i32, i32
  }
  func.func @transform_13(%arg0: i32) -> (i32, i32, i32) {
    %c0_i32 = arith.constant 0 : i32
    %c0_i32_0 = arith.constant 0 : i32
    %c0_i32_1 = arith.constant 0 : i32
    return %arg0, %c0_i32, %c0_i32_0 : i32, i32, i32
  }
  func.func @transform_14(%arg0: i32) -> (i32, i32, i32) {
    %c0_i32 = arith.constant 0 : i32
    %c0_i32_0 = arith.constant 0 : i32
    %c0_i32_1 = arith.constant 0 : i32
    return %arg0, %c0_i32, %c0_i32_0 : i32, i32, i32
  }
}

</mosaic_0001>

<bundles_post_ra>
// kernel: tpu_custom_call.1
= control target key start
LH: loop header
LB: loop body
LE: loop exit
PB: predicated region body
PF: predicated region fallthrough
CT: control target
= control target key end

     0   :  { %s4519_s0 = inlined_call_operand.vmem [shape: f32[2,16,256], index: 0, kind: input, shape index: {}]   ;;  %s4520_s1 = inlined_call_operand.vmem [shape: f32[2,32,64], index: 1, kind: input, shape index: {}]   ;;  %s4521_s2 = inlined_call_operand.vmem [shape: bf16[16,32], index: 2, kind: input, shape index: {}]   ;;  %s4522_s3 = inlined_call_operand.vmem [shape: f32[16,1], index: 3, kind: input, shape index: {}]   ;;  %s4523_s4 = inlined_call_operand.vmem [shape: f32[16,1], index: 4, kind: input, shape index: {}]   ;;  %s4524_s5 = inlined_call_operand.vmem [shape: bf16[64,256], index: 5, kind: input, shape index: {}]   ;;  %s4525_s6 = inlined_call_operand.vmem [shape: bf16[9,256,64], index: 6, kind: input, shape index: {}]   ;;  %s4526_s7 = inlined_call_operand.vmem [shape: f32[9,16,1], index: 7, kind: input, shape index: {}]   ;;  %s4527_s8 = inlined_call_operand.vmem [shape: f32[16,1], index: 8, kind: input, shape index: {}]   ;;  %s4528_s9 = inlined_call_operand.vmem [shape: f32[16,1], index: 9, kind: input, shape index: {}]   ;;  %s4529_s10 = inlined_call_operand.vmem [shape: bf16[32,16], index: 10, kind: input, shape index: {}]   ;;  %s4530_s11 = inlined_call_operand.vmem [shape: f32[32,1], index: 11, kind: input, shape index: {}]   ;;  %s4531_s12 = inlined_call_operand.vmem [shape: f32[32,1], index: 12, kind: input, shape index: {}]   ;;  %s4532_s13 = inlined_call_operand.hbm [shape: f32[2,16,256], index: 13, kind: output, shape index: {0}]   ;;  %s4533_s14 = inlined_call_operand.hbm [shape: f32[2,32,64], index: 14, kind: output, shape index: {1}]  }
   0x1   :  { %4540 = sst [smem:[#allocation12_spill]] %s4519_s0 }
   0x2   :  { %4541 = sst [smem:[#allocation13_spill]] %s4520_s1 }
   0x3   :  { %20 = vsyncpa [#allocation3], 0 }
   0x4   :  { %22 = vsyncpa [#allocation3 + $0x1], 0 }
   0x5   :  { %23 = vsyncpa [#allocation5], 0 }
   0x6   :  { %25 = vsyncpa [#allocation5 + $0x1], 0  ;;  %s3750_s29 = smov 0   ;;  %s3752_s30 = smov 0  }
   0x7   :  { %s3754_s15 = smov 0   ;;  %s3756_s16 = smov 0  }
   0x8 LB: > { %4542 = sst [smem:[#allocation8_spill]] %s3660_s15  ;;  %s3771_s17 = sadd.s32 4294967295, %s3664_s16   ;;  %s3664_s16 = sphi %s3756_s16, %s4554_s16   ;;  %s3660_s15 = sphi %s3754_s15, %s4556_s15   ;;  %s3656_s30 = sphi %s3752_s30, %s4558_s30   ;;  %s3652_s29 = sphi %s3750_s29, %s4557_s29  }
   0x9   : > { %s2683_s18 = sadd.s32 4294967294, %s3664_s16   ;;  %s3775_s19 = sadd.s32 1, %s3664_s16  }
   0xa   : > { %4543 = sst [smem:[#allocation9_spill]] %s3775_s19  ;;  %s321_s20 = sadd.s32 1, %s3660_s15 }
   0xb   : > { %s318_s21 = ssub.s32 %s3664_s16, %s3775_s19  ;;  %p331_p0 = scmp.ne.s32.totalorder %s3660_s15, %s3656_s30 }
   0xc   : > { %p319_p1 = scmp.eq.s32.totalorder %s318_s21, 0  ;;  %p332_p2 = scmp.eq.s32.totalorder %s3771_s17, 1 }
   0xd   : > { %p337_p3 = scmp.ne.s32.totalorder %s3656_s30, %s3652_s29  ;;  %p338_p4 = scmp.eq.s32.totalorder %s2683_s18, 1 }
   0xe   : > { %s3786_s22 = scalar_select %p319_p1, %s3660_s15, %s321_s20  }
   0xf   : > { %p3788_p5 = por %p332_p2, %p331_p0  ;;  %p3792_p6 = por %p338_p4, %p337_p3 }
  0x10   : > { %4544 = sst [smem:[#allocation10_spill]] %s3786_s22  ;;  %p2686_p7 = scmp.ge.s32.totalorder %s3664_s16, 1 }
  0x11   : > { %s4546_s24 = scalar_select %p3792_p6, 1, 0 }
  0x12   : > { %p431_p8 = scmp.lt.s32.totalorder %s3664_s16, 3 }
  0x13   : > { %4547 = sst [smem:[#allocation11_spill]] %s4546_s24 }
  0x14   : > { %p432_p9 = pnand %p2686_p7, %p431_p8 }
  0x15   : > { %p487_p10 = scmp.lt.s32.totalorder (!%p432_p9), %s3771_s17, 1  ;;  %s4548_s0 = sld [smem:[#allocation12_spill]] (!%p432_p9) }
  0x16   : > { %435 = sbr.rel (%p432_p9) target bundleno = 815 (0x32f), region = 72  ;;  %s4549_s1 = sld [smem:[#allocation13_spill]] (!%p432_p9) }
  0x17   : > { %s4403_s26 = sand.u32 (!%p432_p9), 1, %s3656_s30  }
  0x18   : > { %s4538_s27 = sshll.u32 (!%p432_p9), %s4403_s26, 5 }
  0x1b   : > { %v3407_v0 = vld [vmem:[%s4525_s6 + $0x78] sm:$0xff]   ;;  %v3666_v2 = vmov 0.0   ;;  %v3409_v3 = vld [vmem:[%s4525_s6 + $0x70] sm:$0xff]   ;;  %s488_s25 = scalar_select %p487_p10, %s3771_s17, 1  ;;  %vm3667_vm0 = vmmov 0   ;;  %v3411_v5 = vld [vmem:[%s4525_s6 + $0x68] sm:$0xff]  }
  0x1c   : > { %v3408_v1 = vld [vmem:[%s4525_s6 + $0x38] sm:$0xff]   ;;  %3340 = vmatprep.subr.bf16.mxu1 %v3666_v2  ;;  %3139 = vmatprep.subr.bf16.mxu0 %v3407_v0  ;;  %v3410_v4 = vld [vmem:[%s4525_s6 + $0x30] sm:$0xff]   ;;  %v3412_v7 = vld [vmem:[%s4525_s6 + $0x28] sm:$0xff]   ;;  %v3668_v9 = vmov 0   ;;  %vm515_vm1 = vcmask 261120   ;;  %vm639_vm2 = vcmask 523264  }
  0x1d   : > { %3140 = vmatpush3.bf16.msra.mxu0 %v3408_v1  ;;  %3344 = vmatprep.mubr.msk.bf16.mxu1 %vm3667_vm0, %v3666_v2  ;;  %s3132_s28 = sshll.u32 %s488_s25, 5  ;;  %v3413_v8 = vld [vmem:[%s4525_s6 + $0x60] sm:$0xff]   ;;  %v3416_v19 = vld [vmem:[%s4525_s6 + $0x58] sm:$0xff]   ;;  %v3418_v24 = vld [vmem:[%s4525_s6 + $0x50] sm:$0xff]   ;;  %vm2418_vm3 = vcmask 130048   ;;  %s4539_s25 = sshll.u32 %s3771_s17, 9 }
  0x1e   : > { %3141 = vmatprep.subr.bf16.mxu0 %v3409_v3  ;;  %s3818_s24 = scalar_lea.vmem %s4548_s0, %s3132_s28  ;;  %s3823_s22 = scalar_lea.vmem %s4549_s1, %s3132_s28  ;;  %3405 = vset.pattern.permute.xlu0 %v3668_v9  ;;  %v3415_v18 = vld [vmem:[%s4525_s6 + $0x20] sm:$0xff]   ;;  %v3417_v22 = vld [vmem:[%s4525_s6 + $0x18] sm:$0xff]   ;;  %v561_v25 = vld [vmem:[%s4522_s3 + $0x8] sm:$0xff] }
  0x1f   : > { %v499_v6 = vld [vmem:[%s3818_s24 + $0x8] sm:$0xff]  ;;  %v501_v10 = vld [vmem:[%s3818_s24 + $0x18] sm:$0xff]  ;;  %v504_v11 = vld [vmem:[%s3823_s22 + $0x10] sm:$0xff]  ;;  %3406 = vset.pattern.permute.xlu1 %v3668_v9  ;;  %s4409_s28 = scalar_lea.vmem [#allocation2], %s4538_s27  ;;  %s4435_s18 = scalar_lea.hbm %s4532_s13, %s4539_s25 }
  0x20   : > { %v505_v12 = vld [vmem:[%s3823_s22 + $0x18] sm:$0xff]  ;;  %v3835_v14 = vpack.c.bf16 %v501_v10, %v499_v6  ;;  %v502_v15 = vld [vmem:[%s3823_s22] sm:$0xff]  ;;  %v503_v16 = vld [vmem:[%s3823_s22 + $0x8] sm:$0xff]  ;;  %s2561_s0 = sshll.u32 %s4409_s28, 4  ;;  %s4427_s0 = int_to_ptr.vmem [resolvable:$true] %s2561_s0 }
  0x21   : > { %3142 = vmatpush3.bf16.msra.mxu0 %v3410_v4  ;;  %v509_v13 = vpack.c.bf16 %v505_v12, %v504_v11  ;;  %v508_v17 = vpack.c.bf16 %v503_v16, %v502_v15  ;;  %v3414_v20 = vld [vmem:[%s4521_s2] sm:$0xff]   ;;  %v575_v26 = vld [vmem:[%s4523_s4 + $0x8] sm:$0xff]  ;;  %v3419_v27 = vld [vmem:[%s4525_s6 + $0x10] sm:$0xff]   ;;  %s3574_s27 = scalar_lea.vmem %s4427_s0, 512 }
  0x22   : > { %3143 = vmatprep.subr.bf16.mxu0 %v3411_v5  ;;  %v560_v21 = vld [vmem:[%s4522_s3] sm:$0xff]  ;;  %852 = vmatprep.mubr.bf16.mxu0 %v3835_v14  ;;  %v3420_v29 = vld [vmem:[%s4525_s6 + $0x48] sm:$0xff]   ;;  %v2768_v32 = vld [vmem:[%s4526_s7 + $0x10] sm:$0xff]  ;;  %p3575_p11 = scmp.ne.s32.totalorder %s4427_s0, %s3574_s27 }
  0x23   : > { %3341 = vmatpush3.bf16.msra.mxu1 %v509_v13  ;;  %564 = vperm.xlu0 %3405, %v560_v21   ;;  %v574_v23 = vld [vmem:[%s4523_s4] sm:$0xff]  ;;  %v862_v30 = vld [vmem:[%s4526_s7 + $0x8] sm:$0xff]  ;;  %v2769_v35 = vld [vmem:[%s4526_s7 + $0x18] sm:$0xff] }
  0x24   : > { %3342 = vmatprep.subr.bf16.mxu1 %v3666_v2  ;;  %578 = vperm.xlu1 %3406, %v574_v23   ;;  %v861_v28 = vld [vmem:[%s4526_s7] sm:$0xff]  ;;  %v3421_v31 = vld [vmem:[%s4525_s6 + $0x8] sm:$0xff]   ;;  %v500_v36 = vld [vmem:[%s3818_s24 + $0x10] sm:$0xff]  ;;  %p3576_p12 = pnand %p3575_p11, %p3788_p5 }
  0x25   : > { %3144 = vmatpush3.bf16.msra.mxu0 %v3412_v7  ;;  %v3422_v33 = vld [vmem:[%s4525_s6 + $0x40] sm:$0xff]   ;;  %v3424_v39 = vld [vmem:[%s4525_s6 + $0x178] sm:$0xff]   ;;  %v2819_v40 = vld [vmem:[%s4526_s7 + $0x28] sm:$0xff] }
  0x26   : > { %3145 = vmatprep.subr.bf16.mxu0 %v3413_v8  ;;  %v498_v34 = vld [vmem:[%s3818_s24] sm:$0xff]  ;;  %v3425_v42 = vld [vmem:[%s4525_s6 + $0x138] sm:$0xff]   ;;  %v2868_v43 = vld [vmem:[%s4526_s7 + $0x30] sm:$0xff]  ;;  %p3577_p13 = pneg %p3576_p12 }
  0x27   : > { %3343 = vmatpush3.bf16.msra.mxu1 %v508_v17  ;;  %569 = vperm.xlu0 %3405, %v561_v25   ;;  %v3423_v37 = vld [vmem:[%s4525_s6] sm:$0xff]   ;;  %v3905_v41 = vpack.c.bf16 %v500_v36, %v498_v34  ;;  %v3426_v44 = vld [vmem:[%s4525_s6 + $0x170] sm:$0xff]   ;;  %v2869_v45 = vld [vmem:[%s4526_s7 + $0x38] sm:$0xff] }
  0x28   : > { %583 = vperm.xlu1 %3406, %v575_v26   ;;  %v2818_v38 = vld [vmem:[%s4526_s7 + $0x20] sm:$0xff]  ;;  %v3427_v46 = vld [vmem:[%s4525_s6 + $0x130] sm:$0xff]   ;;  %v3428_v48 = vld [vmem:[%s4525_s6 + $0x168] sm:$0xff]  }
  0x29   : > { %3146 = vmatpush3.bf16.msra.mxu0 %v3415_v18  ;;  %v2918_v47 = vld [vmem:[%s4526_s7 + $0x40] sm:$0xff]  ;;  %v2919_v49 = vld [vmem:[%s4526_s7 + $0x48] sm:$0xff]  ;;  %v2968_v51 = vld [vmem:[%s4526_s7 + $0x50] sm:$0xff] }
  0x2a   : > { %3147 = vmatprep.subr.bf16.mxu0 %v3416_v19  ;;  %3345 = vmatmul.mubr.msk.bf16.vlgmr.msra.gmra.mxu1 %vm515_vm1, %v3414_v20  ;;  %v3429_v50 = vld [vmem:[%s4525_s6 + $0x128] sm:$0xff]   ;;  %v3430_v52 = vld [vmem:[%s4525_s6 + $0x160] sm:$0xff]   ;;  %v2969_v53 = vld [vmem:[%s4526_s7 + $0x58] sm:$0xff] }
  0x2b   : > { %675 = vmatprep.mubr.bf16.mxu1 %v3668_v9  ;;  %865 = vperm.xlu0 %3405, %v861_v28   ;;  %v3431_v54 = vld [vmem:[%s4525_s6 + $0x120] sm:$0xff]   ;;  %v3432_v56 = vld [vmem:[%s4525_s6 + $0x158] sm:$0xff]   ;;  %v3019_v57 = vld [vmem:[%s4526_s7 + $0x68] sm:$0xff] }
  0x2c   : > { %870 = vperm.xlu1 %3406, %v862_v30   ;;  %v3018_v55 = vld [vmem:[%s4526_s7 + $0x60] sm:$0xff]  ;;  %v3433_v58 = vld [vmem:[%s4525_s6 + $0x118] sm:$0xff]   ;;  %v3068_v59 = vld [vmem:[%s4526_s7 + $0x70] sm:$0xff] }
  0x2d   : > { %3148 = vmatpush3.bf16.msra.mxu0 %v3417_v22  ;;  %v3434_v60 = vld [vmem:[%s4525_s6 + $0x150] sm:$0xff]   ;;  %v3069_v61 = vld [vmem:[%s4526_s7 + $0x78] sm:$0xff]  ;;  %v3118_v63 = vld [vmem:[%s4526_s7 + $0x80] sm:$0xff] }
  0x2e   : > { %3149 = vmatprep.subr.bf16.mxu0 %v3418_v24  ;;  %v3435_v62 = vld [vmem:[%s4525_s6 + $0x110] sm:$0xff]   ;;  %v3436_v0 = vld [vmem:[%s4525_s6 + $0x148] sm:$0xff]   ;;  %v2373_v3 = vld [vmem:[%s4527_s8] sm:$0xff] }
  0x2f   : > { %1052 = vperm.xlu0 %3405, %v2768_v32   ;;  %v3119_v1 = vld [vmem:[%s4526_s7 + $0x88] sm:$0xff]  ;;  %v3438_v4 = vld [vmem:[%s4525_s6 + $0x140] sm:$0xff]   ;;  %v3440_v8 = vld [vmem:[%s4525_s6 + $0x278] sm:$0xff]  }
  0x30   : > { %1057 = vperm.xlu1 %3406, %v2769_v35   ;;  %v3437_v2 = vld [vmem:[%s4525_s6 + $0x108] sm:$0xff]   ;;  %v3439_v6 = vld [vmem:[%s4525_s6 + $0x100] sm:$0xff]   ;;  %v3441_v10 = vld [vmem:[%s4525_s6 + $0x238] sm:$0xff]  }
  0x31   : > { %3150 = vmatpush3.bf16.msra.mxu0 %v3419_v27  ;;  %v2374_v5 = vld [vmem:[%s4527_s8 + $0x8] sm:$0xff]  ;;  %v2387_v7 = vld [vmem:[%s4528_s9] sm:$0xff]  ;;  %v3442_v12 = vld [vmem:[%s4525_s6 + $0x270] sm:$0xff]  }
  0x32   : > { %3151 = vmatprep.subr.bf16.mxu0 %v3420_v29  ;;  %v2388_v9 = vld [vmem:[%s4528_s9 + $0x8] sm:$0xff]  ;;  %v2474_v11 = vld [vmem:[%s4530_s11] sm:$0xff]  ;;  %v3443_v15 = vld [vmem:[%s4525_s6 + $0x230] sm:$0xff]  }
  0x33   : > { %1239 = vperm.xlu0 %3405, %v2818_v38   ;;  %v2475_v13 = vld [vmem:[%s4530_s11 + $0x8] sm:$0xff]  ;;  %v2476_v16 = vld [vmem:[%s4530_s11 + $0x10] sm:$0xff]  ;;  %v2477_v18 = vld [vmem:[%s4530_s11 + $0x18] sm:$0xff] }
  0x34   : > { %1244 = vperm.xlu1 %3406, %v2819_v40   ;;  %v3444_v17 = vld [vmem:[%s4525_s6 + $0x268] sm:$0xff]   ;;  %v2502_v20 = vld [vmem:[%s4531_s12] sm:$0xff]  ;;  %v2504_v24 = vld [vmem:[%s4531_s12 + $0x10] sm:$0xff] }
  0x35   : > { %3152 = vmatpush3.bf16.msra.mxu0 %v3421_v31  ;;  %v3445_v19 = vld [vmem:[%s4525_s6 + $0x228] sm:$0xff]   ;;  %v3446_v21 = vld [vmem:[%s4525_s6 + $0x260] sm:$0xff]   ;;  %v3448_v25 = vld [vmem:[%s4525_s6 + $0x258] sm:$0xff]  }
  0x36   : > { %3153 = vmatprep.subr.bf16.mxu0 %v3422_v33  ;;  %v2503_v22 = vld [vmem:[%s4531_s12 + $0x8] sm:$0xff]  ;;  %v3447_v23 = vld [vmem:[%s4525_s6 + $0x220] sm:$0xff]   ;;  %v2505_v26 = vld [vmem:[%s4531_s12 + $0x18] sm:$0xff] }
  0x37   : > { %1426 = vperm.xlu0 %3405, %v2868_v43   ;;  %v3449_v27 = vld [vmem:[%s4525_s6 + $0x218] sm:$0xff]   ;;  %v3450_v28 = vld [vmem:[%s4525_s6 + $0x250] sm:$0xff]   ;;  %v3452_v30 = vld [vmem:[%s4525_s6 + $0x248] sm:$0xff]  }
  0x38   : > { %1431 = vperm.xlu1 %3406, %v2869_v45   ;;  %v3451_v29 = vld [vmem:[%s4525_s6 + $0x210] sm:$0xff]   ;;  %v3453_v31 = vld [vmem:[%s4525_s6 + $0x208] sm:$0xff]   ;;  %v3454_v32 = vld [vmem:[%s4525_s6 + $0x240] sm:$0xff]  }
  0x39   : > { %3154 = vmatpush3.bf16.msra.mxu0 %v3423_v37  ;;  %v3455_v33 = vld [vmem:[%s4525_s6 + $0x200] sm:$0xff]   ;;  %v3456_v34 = vld [vmem:[%s4525_s6 + $0x378] sm:$0xff]   ;;  %v3458_v36 = vld [vmem:[%s4525_s6 + $0x370] sm:$0xff]  }
  0x3a   : > { %3183 = vmatprep.subr.bf16.mxu0 %v3424_v39  ;;  %v3457_v35 = vld [vmem:[%s4525_s6 + $0x338] sm:$0xff]   ;;  %v3493_v39 = vld [vmem:[%s4524_s5 + $0x24] ss:$8 sps:$4 sm:$0xff]   ;;  %v3459_v40 = vld [vmem:[%s4525_s6 + $0x330] sm:$0xff]  }
  0x3b   : > { %1613 = vperm.xlu0 %3405, %v2918_v47   ;;  %v3488_v37 = vld [vmem:[%s4524_s5 + $0x30] ss:$8 sps:$4 sm:$0xff]   ;;  %v3490_v38 = vld [vmem:[%s4524_s5 + $0x34] ss:$8 sps:$4 sm:$0xff]   ;;  %v3491_v43 = vld [vmem:[%s4524_s5 + $0x20] ss:$8 sps:$4 sm:$0xff]  }
  0x3c   : > { %853 = vmatmul.mubr.bf16.vlgmr.msra.gmra.mxu0 %v3905_v41  ;;  %1618 = vperm.xlu1 %3406, %v2919_v49   ;;  %v3461_v45 = vld [vmem:[%s4525_s6 + $0x328] sm:$0xff]   ;;  %v3494_v47 = vld [vmem:[%s4524_s5 + $0x10] ss:$8 sps:$4 sm:$0xff]   ;;  %v3463_v49 = vld [vmem:[%s4525_s6 + $0x320] sm:$0xff]  }
  0x3d   : > { %3184 = vmatpush3.bf16.msra.mxu0 %v3425_v42  ;;  %1225 = vmatprep.mubr.bf16.mxu0 %v3835_v14  ;;  %v3460_v42 = vld [vmem:[%s4525_s6 + $0x368] sm:$0xff]  }
  0x3e   : > { %3185 = vmatprep.subr.bf16.mxu0 %v3426_v44  ;;  %651 = vmatprep.subr.bf16.mxu1 %v3490_v38  ;;  %v3496_v44 = vld [vmem:[%s4524_s5 + $0x14] ss:$8 sps:$4 sm:$0xff]  }
  0x3f   : > { %1800 = vperm.xlu0 %3405, %v2968_v51   ;;  %652 = vmatpush1.bf16.msra.mxu1 %v3488_v37  ;;  %v3497_v51 = vld [vmem:[%s4524_s5] ss:$8 sps:$4 sm:$0xff]   ;;  %v3510_v37 = vld [vmem:[%s4525_s6 + $0xd0] sm:$0xff]  }
  0x40   : > { %1805 = vperm.xlu1 %3406, %v2969_v53   ;;  %653 = vmatprep.subr.bf16.mxu1 %v3493_v39  ;;  %v3465_v53 = vld [vmem:[%s4525_s6 + $0x318] sm:$0xff]   ;;  %v3511_v38 = vld [vmem:[%s4525_s6 + $0x90] sm:$0xff]   ;;  %v3512_v39 = vld [vmem:[%s4525_s6 + $0xc8] sm:$0xff]  }
  0x41   : > { %3186 = vmatpush3.bf16.msra.mxu0 %v3427_v46  ;;  %v3462_v46 = vld [vmem:[%s4525_s6 + $0x360] sm:$0xff]  }
  0x42   : > { %3187 = vmatprep.subr.bf16.mxu0 %v3428_v48  ;;  %v3499_v48 = vld [vmem:[%s4524_s5 + $0x4] ss:$8 sps:$4 sm:$0xff]  }
  0x43   : > { %1987 = vperm.xlu0 %3405, %v3018_v55   ;;  %654 = vmatpush1.bf16.msra.mxu1 %v3491_v43  ;;  %v3467_v55 = vld [vmem:[%s4525_s6 + $0x310] sm:$0xff]   ;;  %v3515_v43 = vld [vmem:[%s4525_s6 + $0x80] sm:$0xff]  }
  0x44   : > { %1992 = vperm.xlu1 %3406, %v3019_v57   ;;  %655 = vmatprep.subr.bf16.mxu1 %v3496_v44  ;;  %v3469_v57 = vld [vmem:[%s4525_s6 + $0x308] sm:$0xff]   ;;  %v3516_v44 = vld [vmem:[%s4525_s6 + $0x1f8] sm:$0xff]  }
  0x45   : > { %3188 = vmatpush3.bf16.msra.mxu0 %v3429_v50  ;;  %v3464_v50 = vld [vmem:[%s4525_s6 + $0x358] sm:$0xff]  }
  0x46   : > { %3189 = vmatprep.subr.bf16.mxu0 %v3430_v52  ;;  %v3500_v52 = vld [vmem:[%s4525_s6 + $0xf8] sm:$0xff]  }
  0x47   : > { %2174 = vperm.xlu0 %3405, %v3068_v59   ;;  %656 = vmatpush1.bf16.msra.mxu1 %v3494_v47  ;;  %v3471_v59 = vld [vmem:[%s4525_s6 + $0x300] sm:$0xff]   ;;  %v3519_v47 = vld [vmem:[%s4525_s6 + $0x1b0] sm:$0xff]  }
  0x48   : > { %2179 = vperm.xlu1 %3406, %v3069_v61   ;;  %657 = vmatprep.subr.bf16.mxu1 %v3499_v48  ;;  %v3473_v61 = vld [vmem:[%s4525_s6 + $0x438] sm:$0xff]   ;;  %v3520_v48 = vld [vmem:[%s4525_s6 + $0x1e8] sm:$0xff]  }
  0x49   : > { %3190 = vmatpush3.bf16.msra.mxu0 %v3431_v54  ;;  %v3466_v54 = vld [vmem:[%s4525_s6 + $0x350] sm:$0xff]  }
  0x4a   : > { %3191 = vmatprep.subr.bf16.mxu0 %v3432_v56  ;;  %v3468_v56 = vld [vmem:[%s4525_s6 + $0x348] sm:$0xff]  }
  0x4b   : > { %2361 = vperm.xlu0 %3405, %v3118_v63   ;;  %658 = vmatpush1.bf16.msra.mxu1 %v3497_v51  ;;  %v3475_v63 = vld [vmem:[%s4525_s6 + $0x430] sm:$0xff]   ;;  %v3523_v51 = vld [vmem:[%s4525_s6 + $0x1a0] sm:$0xff]  }
  0x4c   : > { %2366 = vperm.xlu1 %3406, %v3119_v1   ;;  %3161 = vmatprep.subr.bf16.mxu1 %v3500_v52  ;;  %v3477_v1 = vld [vmem:[%s4525_s6 + $0x428] sm:$0xff]   ;;  %v3524_v52 = vld [vmem:[%s4525_s6 + $0x1d8] sm:$0xff]  }
  0x4d   : > { %3192 = vmatpush3.bf16.msra.mxu0 %v3433_v58  ;;  %v3470_v58 = vld [vmem:[%s4525_s6 + $0x340] sm:$0xff]  }
  0x4e   : > { %3193 = vmatprep.subr.bf16.mxu0 %v3434_v60  ;;  %v3472_v60 = vld [vmem:[%s4525_s6 + $0x478] sm:$0xff]  }
  0x4f   : > { %2377 = vperm.xlu0 %3405, %v2373_v3   ;;  %v3479_v3 = vld [vmem:[%s4525_s6 + $0x420] sm:$0xff]  }
  0x50   : > { %2382 = vperm.xlu1 %3406, %v2374_v5   ;;  %v3481_v5 = vld [vmem:[%s4525_s6 + $0x418] sm:$0xff]  }
  0x51   : > { %3194 = vmatpush3.bf16.msra.mxu0 %v3435_v62  ;;  %v3474_v62 = vld [vmem:[%s4525_s6 + $0x470] sm:$0xff]  }
  0x52   : > { %3195 = vmatprep.subr.bf16.mxu0 %v3436_v0  ;;  %v3476_v0 = vld [vmem:[%s4525_s6 + $0x468] sm:$0xff]  }
  0x53   : > { %2391 = vperm.xlu0 %3405, %v2387_v7   ;;  %v3483_v7 = vld [vmem:[%s4525_s6 + $0x410] sm:$0xff]  }
  0x54   : > { %2396 = vperm.xlu1 %3406, %v2388_v9   ;;  %v3485_v9 = vld [vmem:[%s4525_s6 + $0x408] sm:$0xff]  }
  0x55   : > { %3196 = vmatpush3.bf16.msra.mxu0 %v3437_v2  ;;  %v3478_v2 = vld [vmem:[%s4525_s6 + $0x460] sm:$0xff]  }
  0x56   : > { %3197 = vmatprep.subr.bf16.mxu0 %v3438_v4  ;;  %v3480_v4 = vld [vmem:[%s4525_s6 + $0x458] sm:$0xff]  }
  0x57   : > { %2480 = vperm.xlu0 %3405, %v2474_v11   ;;  %v3487_v11 = vld [vmem:[%s4525_s6 + $0x400] sm:$0xff]  }
  0x58   : > { %2485 = vperm.xlu1 %3406, %v2475_v13  }
  0x59   : > { %3198 = vmatpush3.bf16.msra.mxu0 %v3439_v6  ;;  %v3482_v6 = vld [vmem:[%s4525_s6 + $0x450] sm:$0xff]  }
  0x5a   : > { %3227 = vmatprep.subr.bf16.mxu0 %v3440_v8  ;;  %v3484_v8 = vld [vmem:[%s4525_s6 + $0x448] sm:$0xff]  }
  0x5b   : > { %2490 = vperm.xlu0 %3405, %v2476_v16  }
  0x5c   : > { %1226 = vmatmul.mubr.bf16.vlgmr.msra.gmra.mxu0 %v3905_v41  ;;  %2495 = vperm.xlu1 %3406, %v2477_v18  }
  0x5d   : > { %3228 = vmatpush3.bf16.msra.mxu0 %v3441_v10  ;;  %1599 = vmatprep.mubr.bf16.mxu0 %v3835_v14  ;;  %v3486_v10 = vld [vmem:[%s4525_s6 + $0x440] sm:$0xff]  }
  0x5e   : > { %3229 = vmatprep.subr.bf16.mxu0 %v3442_v12 }
  0x5f   : > { %2508 = vperm.xlu0 %3405, %v2502_v20  }
  0x60   : > { %2513 = vperm.xlu1 %3406, %v2503_v22  }
  0x61   : > { %3230 = vmatpush3.bf16.msra.mxu0 %v3443_v15 }
  0x62   : > { %3231 = vmatprep.subr.bf16.mxu0 %v3444_v17 }
  0x63   : > { %2518 = vperm.xlu0 %3405, %v2504_v24  }
  0x64   : > { %2523 = vperm.xlu1 %3406, %v2505_v26  }
  0x65   : > { %3232 = vmatpush3.bf16.msra.mxu0 %v3445_v19 }
  0x66   : > { %3233 = vmatprep.subr.bf16.mxu0 %v3446_v21 }
  0x69   : > { %3234 = vmatpush3.bf16.msra.mxu0 %v3447_v23 }
  0x6a   : > { %3235 = vmatprep.subr.bf16.mxu0 %v3448_v25 }
  0x6d   : > { %3236 = vmatpush3.bf16.msra.mxu0 %v3449_v27  ;;  %v3501_v27 = vld [vmem:[%s4525_s6 + $0xb8] sm:$0xff]  }
  0x6e   : > { %3237 = vmatprep.subr.bf16.mxu0 %v3450_v28 }
  0x71   : > { %3238 = vmatpush3.bf16.msra.mxu0 %v3451_v29  ;;  %v3502_v29 = vld [vmem:[%s4525_s6 + $0xf0] sm:$0xff]  }
  0x72   : > { %3239 = vmatprep.subr.bf16.mxu0 %v3452_v30  ;;  %v3503_v30 = vld [vmem:[%s4525_s6 + $0xb0] sm:$0xff]  }
  0x75   : > { %3240 = vmatpush3.bf16.msra.mxu0 %v3453_v31  ;;  %v3504_v31 = vld [vmem:[%s4525_s6 + $0xe8] sm:$0xff]  }
  0x76   : > { %3241 = vmatprep.subr.bf16.mxu0 %v3454_v32  ;;  %v3505_v32 = vld [vmem:[%s4525_s6 + $0xa8] sm:$0xff]  }
  0x79   : > { %3242 = vmatpush3.bf16.msra.mxu0 %v3455_v33  ;;  %v3506_v33 = vld [vmem:[%s4525_s6 + $0xe0] sm:$0xff]  }
  0x7a   : > { %3271 = vmatprep.subr.bf16.mxu0 %v3456_v34  ;;  %v3507_v34 = vld [vmem:[%s4525_s6 + $0xa0] sm:$0xff]  }
  0x7c   : > { %1600 = vmatmul.mubr.bf16.vlgmr.msra.gmra.mxu0 %v3905_v41 }
  0x7d   : > { %3272 = vmatpush3.bf16.msra.mxu0 %v3457_v35  ;;  %1973 = vmatprep.mubr.bf16.mxu0 %v3835_v14  ;;  %v3508_v35 = vld [vmem:[%s4525_s6 + $0xd8] sm:$0xff]  }
  0x7e   : > { %3273 = vmatprep.subr.bf16.mxu0 %v3458_v36  ;;  %v3509_v36 = vld [vmem:[%s4525_s6 + $0x98] sm:$0xff]  }
  0x81   : > { %3274 = vmatpush3.bf16.msra.mxu0 %v3459_v40  ;;  %v3513_v40 = vld [vmem:[%s4525_s6 + $0x88] sm:$0xff]  }
  0x82   : > { %3275 = vmatprep.subr.bf16.mxu0 %v3460_v42  ;;  %v3514_v42 = vld [vmem:[%s4525_s6 + $0xc0] sm:$0xff]  }
  0x85   : > { %3276 = vmatpush3.bf16.msra.mxu0 %v3461_v45  ;;  %v3517_v45 = vld [vmem:[%s4525_s6 + $0x1b8] sm:$0xff]  }
  0x86   : > { %3277 = vmatprep.subr.bf16.mxu0 %v3462_v46  ;;  %v3518_v46 = vld [vmem:[%s4525_s6 + $0x1f0] sm:$0xff]  }
  0x89   : > { %3278 = vmatpush3.bf16.msra.mxu0 %v3463_v49  ;;  %v3521_v49 = vld [vmem:[%s4525_s6 + $0x1a8] sm:$0xff]  }
  0x8a   : > { %3279 = vmatprep.subr.bf16.mxu0 %v3464_v50  ;;  %v3522_v50 = vld [vmem:[%s4525_s6 + $0x1e0] sm:$0xff]  }
  0x8d   : > { %3280 = vmatpush3.bf16.msra.mxu0 %v3465_v53  ;;  %v3525_v53 = vld [vmem:[%s4525_s6 + $0x198] sm:$0xff]  }
  0x8e   : > { %3281 = vmatprep.subr.bf16.mxu0 %v3466_v54  ;;  %v3526_v54 = vld [vmem:[%s4525_s6 + $0x1d0] sm:$0xff]  }
  0x91   : > { %3282 = vmatpush3.bf16.msra.mxu0 %v3467_v55  ;;  %v3527_v55 = vld [vmem:[%s4525_s6 + $0x190] sm:$0xff]  }
  0x92   : > { %3283 = vmatprep.subr.bf16.mxu0 %v3468_v56  ;;  %v3528_v56 = vld [vmem:[%s4525_s6 + $0x1c8] sm:$0xff]  }
  0x95   : > { %3284 = vmatpush3.bf16.msra.mxu0 %v3469_v57  ;;  %v3529_v57 = vld [vmem:[%s4525_s6 + $0x188] sm:$0xff]  }
  0x96   : > { %3285 = vmatprep.subr.bf16.mxu0 %v3470_v58  ;;  %v3530_v58 = vld [vmem:[%s4525_s6 + $0x1c0] sm:$0xff]  }
  0x99   : > { %3286 = vmatpush3.bf16.msra.mxu0 %v3471_v59  ;;  %v3531_v59 = vld [vmem:[%s4525_s6 + $0x180] sm:$0xff]  }
  0x9a   : > { %3315 = vmatprep.subr.bf16.mxu0 %v3472_v60  ;;  %v3532_v60 = vld [vmem:[%s4525_s6 + $0x2f8] sm:$0xff]  }
  0x9c   : > { %1974 = vmatmul.mubr.bf16.vlgmr.msra.gmra.mxu0 %v3905_v41 }
  0x9d   : > { %3316 = vmatpush3.bf16.msra.mxu0 %v3473_v61  ;;  %2347 = vmatprep.mubr.bf16.mxu0 %v3835_v14  ;;  %v3533_v61 = vld [vmem:[%s4525_s6 + $0x2b8] sm:$0xff]  }
  0x9e   : > { %3317 = vmatprep.subr.bf16.mxu0 %v3474_v62  ;;  %v565_v12 = vpop.permute.xlu0 %564  ;;  %v3534_v62 = vld [vmem:[%s4525_s6 + $0x2f0] sm:$0xff]  }
  0x9f   : > { %v579_v13 = vpop.permute.xlu1 %578 }
  0xa1   : > { %3318 = vmatpush3.bf16.msra.mxu0 %v3475_v63  ;;  %v3535_v63 = vld [vmem:[%s4525_s6 + $0x2b0] sm:$0xff]  }
  0xa2   : > { %3319 = vmatprep.subr.bf16.mxu0 %v3476_v0  ;;  %v570_v18 = vpop.permute.xlu0 %569  ;;  %v3536_v0 = vld [vmem:[%s4525_s6 + $0x2e8] sm:$0xff]  }
  0xa3   : > { %v584_v22 = vpop.permute.xlu1 %583 }
  0xa5   : > { %3320 = vmatpush3.bf16.msra.mxu0 %v3477_v1  ;;  %v3537_v1 = vld [vmem:[%s4525_s6 + $0x2a8] sm:$0xff]  }
  0xa6   : > { %3321 = vmatprep.subr.bf16.mxu0 %v3478_v2  ;;  %v3538_v2 = vld [vmem:[%s4525_s6 + $0x2e0] sm:$0xff]  }
  0xa9   : > { %3322 = vmatpush3.bf16.msra.mxu0 %v3479_v3  ;;  %v3539_v3 = vld [vmem:[%s4525_s6 + $0x2a0] sm:$0xff]  }
  0xaa   : > { %3323 = vmatprep.subr.bf16.mxu0 %v3480_v4  ;;  %v3540_v4 = vld [vmem:[%s4525_s6 + $0x2d8] sm:$0xff]  }
  0xad   : > { %3324 = vmatpush3.bf16.msra.mxu0 %v3481_v5  ;;  %v3541_v5 = vld [vmem:[%s4525_s6 + $0x298] sm:$0xff]  }
  0xae   : > { %3325 = vmatprep.subr.bf16.mxu0 %v3482_v6  ;;  %v3542_v6 = vld [vmem:[%s4525_s6 + $0x2d0] sm:$0xff]  }
  0xb1   : > { %3326 = vmatpush3.bf16.msra.mxu0 %v3483_v7  ;;  %v3543_v7 = vld [vmem:[%s4525_s6 + $0x290] sm:$0xff]  }
  0xb2   : > { %3327 = vmatprep.subr.bf16.mxu0 %v3484_v8  ;;  %v3544_v8 = vld [vmem:[%s4525_s6 + $0x2c8] sm:$0xff]  }
  0xb5   : > { %3328 = vmatpush3.bf16.msra.mxu0 %v3485_v9  ;;  %v3545_v9 = vld [vmem:[%s4525_s6 + $0x288] sm:$0xff]  }
  0xb6   : > { %3329 = vmatprep.subr.bf16.mxu0 %v3486_v10  ;;  %v3546_v10 = vld [vmem:[%s4525_s6 + $0x2c0] sm:$0xff]  }
  0xb9   : > { %3330 = vmatpush3.bf16.msra.mxu0 %v3487_v11  ;;  %v3547_v11 = vld [vmem:[%s4525_s6 + $0x280] sm:$0xff]  }
  0xbc   : > { %2348 = vmatmul.mubr.bf16.vlgmr.msra.gmra.mxu0 %v3905_v41 }
  0xea   : > { %v553_v15 = vpop.f32.mrf.mxu1 }
  0xeb   : > { %v572_v16 = vmul.f32 %v565_v12, %v553_v15  ;;  %v3548_v12 = vld [vmem:[%s4525_s6 + $0x3f8] sm:$0xff]   ;;  %v3550_v15 = vld [vmem:[%s4525_s6 + $0x3f0] sm:$0xff]  }
  0xec   : > { %v3346_v17 = vpop.f32.mrf.mxu1 }
  0xed   : > { %v586_v20 = vadd.f32 %v579_v13, %v572_v16  ;;  %v3549_v13 = vld [vmem:[%s4525_s6 + $0x3b8] sm:$0xff]   ;;  %v3551_v16 = vld [vmem:[%s4525_s6 + $0x3b0] sm:$0xff]   ;;  %v3552_v17 = vld [vmem:[%s4525_s6 + $0x3e8] sm:$0xff]  }
  0xee   : > { %v556_v19 = vpop.f32.mrf.mxu1 }
  0xef   : > { %v573_v21 = vmul.f32 %v570_v18, %v556_v19  ;;  %v588_v25 = vmax.f32 %v586_v20, 0.0  ;;  %v3553_v18 = vld [vmem:[%s4525_s6 + $0x3a8] sm:$0xff]   ;;  %v3554_v19 = vld [vmem:[%s4525_s6 + $0x3e0] sm:$0xff]   ;;  %v3556_v20 = vld [vmem:[%s4525_s6 + $0x3d8] sm:$0xff]  }
  0xf0   : > { %v3347_v23 = vpop.f32.mrf.mxu1 }
  0xf1   : > { %v587_v24 = vadd.f32 %v584_v22, %v573_v21  ;;  %v3557_v21 = vld [vmem:[%s4525_s6 + $0x398] sm:$0xff]   ;;  %v3558_v22 = vld [vmem:[%s4525_s6 + $0x3d0] sm:$0xff]  }
  0xf2   : > { %v3559_v23 = vld [vmem:[%s4525_s6 + $0x390] sm:$0xff]  }
  0xf3   : > { %v589_v26 = vmax.f32 %v587_v24, 0.0  ;;  %v3560_v24 = vld [vmem:[%s4525_s6 + $0x3c8] sm:$0xff]  }
  0xf5   : > { %v590_v28 = vpack.c.bf16 %v589_v26, %v588_v25  ;;  %v3561_v25 = vld [vmem:[%s4525_s6 + $0x388] sm:$0xff]   ;;  %v3562_v26 = vld [vmem:[%s4525_s6 + $0x3c0] sm:$0xff]  }
  0xf7   : > { %2703 = vmatmul.mubr.msk.bf16.vlgmr.msra.gmra.mxu1 %vm639_vm2, %v590_v28 }
  0xf8   : > { %3162 = vmatpush3.bf16.msra.mxu1 %v3501_v27  ;;  %1038 = vmatprep.mubr.bf16.mxu1 %v3835_v14  ;;  %v3563_v27 = vld [vmem:[%s4525_s6 + $0x380] sm:$0xff]  }
  0xf9   : > { %3163 = vmatprep.subr.bf16.mxu1 %v3502_v29  ;;  %v3566_v29 = vld [vmem:[%s3818_s24] sm:$0xff] }
  0xfc   : > { %3164 = vmatpush3.bf16.msra.mxu1 %v3503_v30 }
  0xfd   : > { %3165 = vmatprep.subr.bf16.mxu1 %v3504_v31 }
 0x100   : > { %3166 = vmatpush3.bf16.msra.mxu1 %v3505_v32  ;;  %v3567_v32 = vld [vmem:[%s3818_s24 + $0x8] sm:$0xff] }
 0x101   : > { %3167 = vmatprep.subr.bf16.mxu1 %v3506_v33 }
 0x104   : > { %3168 = vmatpush3.bf16.msra.mxu1 %v3507_v34  ;;  %v3568_v34 = vld [vmem:[%s3818_s24 + $0x10] sm:$0xff] }
 0x105   : > { %3169 = vmatprep.subr.bf16.mxu1 %v3508_v35 }
 0x108   : > { %3170 = vmatpush3.bf16.msra.mxu1 %v3509_v36 }
 0x109   : > { %3171 = vmatprep.subr.bf16.mxu1 %v3510_v37  ;;  %v3569_v37 = vld [vmem:[%s3818_s24 + $0x18] sm:$0xff]  ;;  %s3669_s24 = smov [#allocation2]  }
 0x10c   : > { %3172 = vmatpush3.bf16.msra.mxu1 %v3511_v38 }
 0x10d   : > { %3173 = vmatprep.subr.bf16.mxu1 %v3512_v39  ;;  %v3564_v39 = vld [vmem:[%s4529_s10] sm:$0xff]  }
 0x110   : > { %3174 = vmatpush3.bf16.msra.mxu1 %v3513_v40  ;;  %v3155_v40 = vpop.f32.mrf.mxu0 }
 0x111   : > { %3175 = vmatprep.subr.bf16.mxu1 %v3514_v42 }
 0x112   : > { %v3156_v42 = vpop.f32.mrf.mxu0 }
 0x114   : > { %3176 = vmatpush3.bf16.msra.mxu1 %v3515_v43  ;;  %v3158_v43 = vpop.f32.mrf.mxu0 }
 0x115   : > { %3205 = vmatprep.subr.bf16.mxu1 %v3516_v44 }
 0x116   : > { %v3159_v44 = vpop.f32.mrf.mxu0 }
 0x117   : > { %1039 = vmatmul.mubr.bf16.vlgmr.msra.gmra.mxu1 %v3905_v41 }
 0x118   : > { %3206 = vmatpush3.bf16.msra.mxu1 %v3517_v45  ;;  %1412 = vmatprep.mubr.bf16.mxu1 %v3835_v14 }
 0x119   : > { %3207 = vmatprep.subr.bf16.mxu1 %v3518_v46  ;;  %v866_v46 = vpop.permute.xlu0 %865 }
 0x11c   : > { %3208 = vmatpush3.bf16.msra.mxu1 %v3519_v47  ;;  %v3199_v45 = vpop.f32.mrf.mxu0 }
 0x11d   : > { %3209 = vmatprep.subr.bf16.mxu1 %v3520_v48 }
 0x11e   : > { %v3200_v47 = vpop.f32.mrf.mxu0 }
 0x120   : > { %3210 = vmatpush3.bf16.msra.mxu1 %v3521_v49  ;;  %v871_v49 = vpop.permute.xlu1 %870 }
 0x121   : > { %3211 = vmatprep.subr.bf16.mxu1 %v3522_v50  ;;  %v3202_v50 = vpop.f32.mrf.mxu0 }
 0x124   : > { %3212 = vmatpush3.bf16.msra.mxu1 %v3523_v51 }
 0x125   : > { %3213 = vmatprep.subr.bf16.mxu1 %v3524_v52  ;;  %v1053_v52 = vpop.permute.xlu0 %1052 }
 0x128   : > { %3214 = vmatpush3.bf16.msra.mxu1 %v3525_v53  ;;  %v1058_v53 = vpop.permute.xlu1 %1057 }
 0x129   : > { %3215 = vmatprep.subr.bf16.mxu1 %v3526_v54  ;;  %v3203_v54 = vpop.f32.mrf.mxu0 }
 0x12c   : > { %3216 = vmatpush3.bf16.msra.mxu1 %v3527_v55 }
 0x12d   : > { %3217 = vmatprep.subr.bf16.mxu1 %v3528_v56 }
 0x130   : > { %3218 = vmatpush3.bf16.msra.mxu1 %v3529_v57  ;;  %v1240_v57 = vpop.permute.xlu0 %1239 }
 0x131   : > { %3219 = vmatprep.subr.bf16.mxu1 %v3530_v58 }
 0x134   : > { %3220 = vmatpush3.bf16.msra.mxu1 %v3531_v59  ;;  %v1245_v59 = vpop.permute.xlu1 %1244 }
 0x135   : > { %3249 = vmatprep.subr.bf16.mxu1 %v3532_v60 }
 0x137   : > { %1413 = vmatmul.mubr.bf16.vlgmr.msra.gmra.mxu1 %v3905_v41 }
 0x138   : > { %3250 = vmatpush3.bf16.msra.mxu1 %v3533_v61  ;;  %1786 = vmatprep.mubr.bf16.mxu1 %v3835_v14 }
 0x139   : > { %3251 = vmatprep.subr.bf16.mxu1 %v3534_v62  ;;  %v1427_v62 = vpop.permute.xlu0 %1426 }
 0x13c   : > { %3252 = vmatpush3.bf16.msra.mxu1 %v3535_v63  ;;  %v3243_v56 = vpop.f32.mrf.mxu0 }
 0x13d   : > { %3253 = vmatprep.subr.bf16.mxu1 %v3536_v0 }
 0x13e   : > { %v3244_v60 = vpop.f32.mrf.mxu0 }
 0x140   : > { %3254 = vmatpush3.bf16.msra.mxu1 %v3537_v1  ;;  %v3246_v63 = vpop.f32.mrf.mxu0  ;;  %v1432_v1 = vpop.permute.xlu1 %1431 }
 0x141   : > { %3255 = vmatprep.subr.bf16.mxu1 %v3538_v2 }
 0x142   : > { %v3247_v2 = vpop.f32.mrf.mxu0 }
 0x144   : > { %3256 = vmatpush3.bf16.msra.mxu1 %v3539_v3 }
 0x145   : > { %3257 = vmatprep.subr.bf16.mxu1 %v3540_v4  ;;  %v1614_v4 = vpop.permute.xlu0 %1613 }
 0x148   : > { %3258 = vmatpush3.bf16.msra.mxu1 %v3541_v5 }
 0x149   : > { %3259 = vmatprep.subr.bf16.mxu1 %v3542_v6  ;;  %v1619_v6 = vpop.permute.xlu1 %1618 }
 0x14c   : > { %3260 = vmatpush3.bf16.msra.mxu1 %v3543_v7 }
 0x14d   : > { %3261 = vmatprep.subr.bf16.mxu1 %v3544_v8 }
 0x150   : > { %3262 = vmatpush3.bf16.msra.mxu1 %v3545_v9 }
 0x151   : > { %3263 = vmatprep.subr.bf16.mxu1 %v3546_v10 }
 0x154   : > { %3264 = vmatpush3.bf16.msra.mxu1 %v3547_v11  ;;  %v1801_v11 = vpop.permute.xlu0 %1800 }
 0x155   : > { %3293 = vmatprep.subr.bf16.mxu1 %v3548_v12  ;;  %v3157_v12 = vadd.f32 %v3156_v42, %v3155_v40 }
 0x157   : > { %1787 = vmatmul.mubr.bf16.vlgmr.msra.gmra.mxu1 %v3905_v41 }
 0x158   : > { %3294 = vmatpush3.bf16.msra.mxu1 %v3549_v13  ;;  %2160 = vmatprep.mubr.bf16.mxu1 %v3835_v14  ;;  %v3555_v14 = vld [vmem:[%s4525_s6 + $0x3a0] sm:$0xff]   ;;  %v1806_v13 = vpop.permute.xlu1 %1805 }
 0x159   : > { %3295 = vmatprep.subr.bf16.mxu1 %v3550_v15 }
 0x15c   : > { %3296 = vmatpush3.bf16.msra.mxu1 %v3551_v16  ;;  %v3287_v5 = vpop.f32.mrf.mxu0 }
 0x15d   : > { %3297 = vmatprep.subr.bf16.mxu1 %v3552_v17  ;;  %v3160_v17 = vadd.f32 %v3159_v44, %v3158_v43 }
 0x15e   : > { %v3288_v9 = vpop.f32.mrf.mxu0 }
 0x160   : > { %3298 = vmatpush3.bf16.msra.mxu1 %v3553_v18  ;;  %v3290_v18 = vpop.f32.mrf.mxu0 }
 0x161   : > { %3299 = vmatprep.subr.bf16.mxu1 %v3554_v19 }
 0x164   : > { %3300 = vmatpush3.bf16.msra.mxu1 %v3555_v14  ;;  %v873_v14 = vmul.f32 %v3157_v12, %v866_v46  ;;  %v3248_v46 = vadd.f32 %v3247_v2, %v3246_v63 }
 0x165   : > { %3301 = vmatprep.subr.bf16.mxu1 %v3556_v20  ;;  %v3201_v20 = vadd.f32 %v3200_v47, %v3199_v45 }
 0x168   : > { %3302 = vmatpush3.bf16.msra.mxu1 %v3557_v21 }
 0x169   : > { %3303 = vmatprep.subr.bf16.mxu1 %v3558_v22  ;;  %v1988_v22 = vpop.permute.xlu0 %1987 }
 0x16c   : > { %3304 = vmatpush3.bf16.msra.mxu1 %v3559_v23 }
 0x16d   : > { %3305 = vmatprep.subr.bf16.mxu1 %v3560_v24  ;;  %v2175_v42 = vpop.permute.xlu0 %2174 }
 0x170   : > { %3306 = vmatpush3.bf16.msra.mxu1 %v3561_v25  ;;  %v874_v25 = vmul.f32 %v3160_v17, %v871_v49 }
 0x171   : > { %3307 = vmatprep.subr.bf16.mxu1 %v3562_v26  ;;  %v3291_v26 = vpop.f32.mrf.mxu0 }
 0x174   : > { %3308 = vmatpush3.bf16.msra.mxu1 %v3563_v27 }
 0x177   : > { %2161 = vmatmul.mubr.bf16.vlgmr.msra.gmra.mxu1 %v3905_v41 }
 0x178   : > { %3350 = vmatprep.mubr.msk.bf16.mxu1 %vm2418_vm3, %v3564_v39 }
 0x1b7   : > { %v677_v28 = vpop.f32.mrf.mxu1 }
 0x1b8   : > { %v678_v30 = vadd.f32 %v3566_v29, %v677_v28  ;;  %v1993_v28 = vpop.permute.xlu1 %1992  ;;  %v1247_v29 = vmul.f32 %v3201_v20, %v1240_v57 }
 0x1b9   : > { %v679_v31 = vpop.f32.mrf.mxu1 }
 0x1ba   : > { %686 = vst [vmem:[%s4409_s28] sm:$0xff] %v678_v30  ;;  %v680_v41 = vadd.f32 %v3567_v32, %v679_v31  ;;  %v3204_v30 = vadd.f32 %v3203_v54, %v3202_v50  ;;  %v3289_v50 = vadd.f32 %v3288_v9, %v3287_v5 }
 0x1bb   : > { %v681_v33 = vpop.f32.mrf.mxu1 }
 0x1bc   : > { %687 = vst [vmem:[%s4409_s28 + $0x8] sm:$0xff] %v680_v41  ;;  %v682_v35 = vadd.f32 %v3568_v34, %v681_v33  ;;  %v3245_v41 = vadd.f32 %v3244_v60, %v3243_v56  ;;  %v3331_v33 = vpop.f32.mrf.mxu0  ;;  %v2180_v45 = vpop.permute.xlu1 %2179 }
 0x1bd   : > { %v683_v36 = vpop.f32.mrf.mxu1 }
 0x1be   : > { %688 = vst [vmem:[%s4409_s28 + $0x10] sm:$0xff] %v682_v35  ;;  %v684_v38 = vadd.f32 %v3569_v37, %v683_v36  ;;  %v1621_v43 = vmul.f32 %v3245_v41, %v1614_v4  ;;  %v3332_v44 = vpop.f32.mrf.mxu0 }
 0x1c0   : > { %689 = vst [vmem:[%s4409_s28 + $0x18] sm:$0xff] %v684_v38  ;;  %v1248_v38 = vmul.f32 %v3204_v30, %v1245_v59  ;;  %v3292_v59 = vadd.f32 %v3291_v26, %v3290_v18  ;;  %v3565_v30 = vld [vmem:[%s4529_s10 + $0x8] sm:$0xff]   ;;  %s3578_s28 = sshll.u32 %s3669_s24, 4  ;;  %s3579_s28 = int_to_ptr.vmem [resolvable:$false] %s3578_s28 }
 0x1c1   : > { %s3580_s21 = scalar_lea.vmem %s3579_s28, 1024  ;;  %p3581_p0 = scmp.lt.s32.totalorder %s4427_s0, %s3579_s28 }
 0x1c2   : > { %p3582_p1 = scmp.lt.s32.totalorder %s3580_s21, %s3574_s27 }
 0x1c4   : > { %p3583_p2 = por %p3582_p1, %p3581_p0 }
 0x1c6   : > { %p3584_p3 = pnand %p3583_p2, %p3577_p13 }
 0x1d7   : > { %v3177_v48 = vpop.f32.mrf.mxu1 }
 0x1d9   : > { %v3178_v51 = vpop.f32.mrf.mxu1 }
 0x1da   : > { %v3179_v8 = vadd.f32 %v3178_v51, %v3177_v48 }
 0x1db   : > { %v3180_v55 = vpop.f32.mrf.mxu1 }
 0x1dc   : > { %v1060_v15 = vmul.f32 %v3179_v8, %v1053_v52  ;;  %v1996_v8 = vmul.f32 %v3292_v59, %v1993_v28 }
 0x1dd   : > { %v3181_v58 = vpop.f32.mrf.mxu1 }
 0x1de   : > { %v3182_v16 = vadd.f32 %v3181_v58, %v3180_v55  ;;  %v1062_v23 = vadd.f32 %v1060_v15, %v873_v14  ;;  %v1622_v55 = vmul.f32 %v3248_v46, %v1619_v6  ;;  %v2362_v58 = vpop.permute.xlu0 %2361 }
 0x1e0   : > { %v1061_v24 = vmul.f32 %v3182_v16, %v1058_v53  ;;  %v1249_v35 = vadd.f32 %v1247_v29, %v1062_v23  ;;  %v3334_v53 = vpop.f32.mrf.mxu0 }
 0x1e2   : > { %v1063_v34 = vadd.f32 %v1061_v24, %v874_v25  ;;  %v3335_v63 = vpop.f32.mrf.mxu0 }
 0x1e4   : > { %v1250_v47 = vadd.f32 %v1248_v38, %v1063_v34 }
 0x1f7   : > { %v3221_v61 = vpop.f32.mrf.mxu1 }
 0x1f9   : > { %v3222_v0 = vpop.f32.mrf.mxu1 }
 0x1fa   : > { %v3223_v21 = vadd.f32 %v3222_v0, %v3221_v61  ;;  %v2367_v61 = vpop.permute.xlu1 %2366  ;;  %v3333_v0 = vadd.f32 %v3332_v44, %v3331_v33 }
 0x1fb   : > { %v3224_v3 = vpop.f32.mrf.mxu1 }
 0x1fc   : > { %v1434_v31 = vmul.f32 %v3223_v21, %v1427_v62  ;;  %v1995_v62 = vmul.f32 %v3289_v50, %v1988_v22 }
 0x1fd   : > { %v3225_v7 = vpop.f32.mrf.mxu1 }
 0x1fe   : > { %v3226_v32 = vadd.f32 %v3225_v7, %v3224_v3  ;;  %v1436_v39 = vadd.f32 %v1434_v31, %v1249_v35  ;;  %v2383_v18 = vpop.permute.xlu1 %2382 }
 0x200   : > { %v1435_v40 = vmul.f32 %v3226_v32, %v1432_v1  ;;  %v1623_v52 = vadd.f32 %v1621_v43, %v1436_v39 }
 0x202   : > { %v1437_v51 = vadd.f32 %v1435_v40, %v1250_v47  ;;  %v2397_v25 = vpop.permute.xlu1 %2396 }
 0x204   : > { %v1624_v1 = vadd.f32 %v1622_v55, %v1437_v51 }
 0x217   : > { %v3265_v10 = vpop.f32.mrf.mxu1 }
 0x219   : > { %v3266_v19 = vpop.f32.mrf.mxu1 }
 0x21a   : > { %v3267_v36 = vadd.f32 %v3266_v19, %v3265_v10  ;;  %v2369_v10 = vmul.f32 %v3333_v0, %v2362_v58 }
 0x21b   : > { %v3268_v27 = vpop.f32.mrf.mxu1 }
 0x21c   : > { %v1808_v48 = vmul.f32 %v3267_v36, %v1801_v11  ;;  %v3336_v11 = vadd.f32 %v3335_v63, %v3334_v53 }
 0x21d   : > { %v3269_v37 = vpop.f32.mrf.mxu1 }
 0x21e   : > { %v3270_v49 = vadd.f32 %v3269_v37, %v3268_v27  ;;  %v1810_v56 = vadd.f32 %v1808_v48, %v1623_v52  ;;  %v2370_v19 = vmul.f32 %v3336_v11, %v2367_v61 }
 0x220   : > { %v1809_v57 = vmul.f32 %v3270_v49, %v1806_v13  ;;  %v1997_v7 = vadd.f32 %v1995_v62, %v1810_v56  ;;  %v2378_v13 = vpop.permute.xlu0 %2377 }
 0x222   : > { %v1811_v4 = vadd.f32 %v1809_v57, %v1624_v1 }
 0x224   : > { %v1998_v16 = vadd.f32 %v1996_v8, %v1811_v4  ;;  %v2392_v22 = vpop.permute.xlu0 %2391 }
 0x237   : > { %v3309_v54 = vpop.f32.mrf.mxu1 }
 0x239   : > { %v3310_v60 = vpop.f32.mrf.mxu1 }
 0x23a   : > { %v3311_v3 = vadd.f32 %v3310_v60, %v3309_v54 }
 0x23b   : > { %v3312_v2 = vpop.f32.mrf.mxu1 }
 0x23c   : > { %v2182_v5 = vmul.f32 %v3311_v3, %v2175_v42 }
 0x23d   : > { %v3313_v9 = vpop.f32.mrf.mxu1 }
 0x23e   : > { %v2184_v6 = vadd.f32 %v2182_v5, %v1997_v7  ;;  %v3314_v12 = vadd.f32 %v3313_v9, %v3312_v2 }
 0x240   : > { %v2371_v15 = vadd.f32 %v2369_v10, %v2184_v6  ;;  %v2183_v17 = vmul.f32 %v3314_v12, %v2180_v45 }
 0x242   : > { %v2185_v14 = vadd.f32 %v2183_v17, %v1998_v16  ;;  %v2385_v20 = vmul.f32 %v2378_v13, %v2371_v15 }
 0x244   : > { %v2372_v21 = vadd.f32 %v2370_v19, %v2185_v14  ;;  %v2399_v24 = vadd.f32 %v2392_v22, %v2385_v20 }
 0x246   : > { %v2386_v23 = vmul.f32 %v2383_v18, %v2372_v21  ;;  %v2401_v27 = vmax.f32 %v2399_v24, 0.0 }
 0x248   : > { %v2400_v26 = vadd.f32 %v2397_v25, %v2386_v23 }
 0x24a   : > { %v2402_v28 = vmax.f32 %v2400_v26, 0.0 }
 0x24c   : > { %v2407_v29 = vpack.c.bf16 %v2402_v28, %v2401_v27 }
 0x24e   : > { %3348 = vmatprep.subr.bf16.mxu1 %v2407_v29 }
 0x24f   : > { %3349 = vmatpush3.bf16.msra.mxu1 %v2407_v29 }
 0x252   : > { %3351 = vmatmul.mubr.msk.bf16.vlgmr.msra.gmra.mxu1 %vm2418_vm3, %v3565_v30 }
 0x253   : > { %3587 = shalt.err (!%p3584_p3)
}
 0x254   : > { %s3588_s15 = scalar_lea.hbm %s4435_s18, 512  ;;  %s3592_s24 = scalar_lea.hbm %s4532_s13, 1024 }
 0x255   : > { %p3589_p4 = scmp.ne.s32.totalorder %s4435_s18, %s3588_s15  ;;  %p3593_p9 = scmp.lt.s32.totalorder %s4435_s18, %s4532_s13 }
 0x256   : > { %p3594_p10 = scmp.lt.s32.totalorder %s3592_s24, %s3588_s15 }
 0x257   : > { %p3590_p7 = pnand %p3589_p4, %p3788_p5 }
 0x258   : > { %p3595_p11 = por %p3594_p10, %p3593_p9 }
 0x259   : > { %p3591_p8 = pneg %p3590_p7 }
 0x25b   : > { %p3596_p12 = pnand %p3595_p11, %p3591_p8 }
 0x25d   : > { %3599 = shalt.err (!%p3596_p12)
}
 0x25e   : > { %s3670_s27 = smov 256   ;;  %s3671_s28 = smov 16   ;;  %v2481_v31 = vpop.permute.xlu0 %2480  ;;  %v2486_v32 = vpop.permute.xlu1 %2485  ;;  %v3570_v49 = vld [vmem:[%s3823_s22 + $0x10] sm:$0xff]  ;;  %v3571_v54 = vld [vmem:[%s3823_s22] sm:$0xff]  ;;  %v3572_v58 = vld [vmem:[%s3823_s22 + $0x18] sm:$0xff] }
 0x25f   : > { %s4550_s21 = scalar_lea.sflag [#allocation3], %s4403_s26  ;;  %s4551_s1 = sshll.u32 %s4403_s26, 5  ;;  %v3573_v61 = vld [vmem:[%s3823_s22 + $0x8] sm:$0xff] }
 0x260   : > { %3354 = dma.vmem_to_hbm [thread:$0]  (%p3788_p5), %s4427_s0, 512, %s4435_s18, %s4550_s21, %s3670_s27, %s3670_s27, %s3671_s28  }
 0x261   : > { %s486_s0 = scalar_lea.vmem [#allocation4], %s4551_s1  ;;  %s4552_s18 = sshll.u32 %s3771_s17, 9 }
 0x262   : > { %v2491_v41 = vpop.permute.xlu0 %2490  ;;  %v2496_v33 = vpop.permute.xlu1 %2495  ;;  %s2577_s25 = sshll.u32 %s486_s0, 4  ;;  %s4474_s19 = scalar_lea.hbm %s4533_s14, %s4552_s18  ;;  %s4467_s25 = int_to_ptr.vmem [resolvable:$true] %s2577_s25 }
 0x263   : > { %s2548_s24 = scalar_lea.sflag [#allocation5], %s4403_s26  ;;  %s3600_s27 = scalar_lea.vmem %s4467_s25, 512 }
 0x264   : > { %p3601_p13 = scmp.ne.s32.totalorder %s4467_s25, %s3600_s27  ;;  %s3672_s17 = smov [#allocation4]  }
 0x265   : > { %s3604_s28 = sshll.u32 %s3672_s17, 4  ;;  %s3605_s28 = int_to_ptr.vmem [resolvable:$false] %s3604_s28 }
 0x266   : > { %v2509_v34 = vpop.permute.xlu0 %2508  ;;  %v2514_v35 = vpop.permute.xlu1 %2513  ;;  %p3602_p0 = pnand %p3601_p13, %p3788_p5  ;;  %s3606_s21 = scalar_lea.vmem %s3605_s28, 1024 }
 0x267   : > { %p3607_p2 = scmp.lt.s32.totalorder %s4467_s25, %s3605_s28  ;;  %p3608_p3 = scmp.lt.s32.totalorder %s3606_s21, %s3600_s27 }
 0x268   : > { %p3603_p1 = pneg %p3602_p0 }
 0x269   : > { %p3609_p4 = por %p3608_p3, %p3607_p2 }
 0x26a   : > { %v2519_v38 = vpop.permute.xlu0 %2518  ;;  %v2524_v47 = vpop.permute.xlu1 %2523 }
 0x26b   : > { %p3610_p7 = pnand %p3609_p4, %p3603_p1 }
 0x312   : > { %v3352_v36 = vpop.f32.mrf.mxu1 }
 0x313   : > { %v2500_v37 = vmul.f32 %v3352_v36, %v2491_v41 }
 0x314   : > { %v2459_v39 = vpop.f32.mrf.mxu1 }
 0x315   : > { %v2528_v40 = vadd.f32 %v2519_v38, %v2500_v37  ;;  %v2498_v42 = vmul.f32 %v2481_v31, %v2459_v39 }
 0x316   : > { %v3353_v43 = vpop.f32.mrf.mxu1 }
 0x317   : > { %v2532_v44 = vmax.f32 %v2528_v40, 0.0  ;;  %v2526_v45 = vadd.f32 %v2509_v34, %v2498_v42  ;;  %v2501_v46 = vmul.f32 %v3353_v43, %v2496_v33 }
 0x318   : > { %v2462_v48 = vpop.f32.mrf.mxu1 }
 0x319   : > { %v2536_v50 = vadd.f32 %v3570_v49, %v2532_v44  ;;  %v2530_v51 = vmax.f32 %v2526_v45, 0.0  ;;  %v2529_v52 = vadd.f32 %v2524_v47, %v2501_v46  ;;  %v2499_v53 = vmul.f32 %v2486_v32, %v2462_v48 }
 0x31b   : > { %2540 = vst.msk [vmem:[%s486_s0 + $0x10] sm:$0xff] %vm639_vm2, %v2536_v50  ;;  %v2534_v55 = vadd.f32 %v3571_v54, %v2530_v51  ;;  %v2533_v56 = vmax.f32 %v2529_v52, 0.0  ;;  %v2527_v57 = vadd.f32 %v2514_v35, %v2499_v53 }
 0x31d   : > { %2538 = vst.msk [vmem:[%s486_s0] sm:$0xff] %vm639_vm2, %v2534_v55  ;;  %v2537_v59 = vadd.f32 %v3572_v58, %v2533_v56  ;;  %v2531_v60 = vmax.f32 %v2527_v57, 0.0 }
 0x31f   : > { %2541 = vst.msk [vmem:[%s486_s0 + $0x18] sm:$0xff] %vm639_vm2, %v2537_v59  ;;  %v2535_v62 = vadd.f32 %v3573_v61, %v2531_v60 }
 0x321   : > { %2539 = vst.msk [vmem:[%s486_s0 + $0x8] sm:$0xff] %vm639_vm2, %v2535_v62 }
 0x322   : > { %3613 = shalt.err (!%p3610_p7)
}
 0x323   : > { %s3614_s22 = scalar_lea.hbm %s4474_s19, 512  ;;  %s3618_s18 = scalar_lea.hbm %s4533_s14, 1024 }
 0x324   : > { %p3615_p8 = scmp.ne.s32.totalorder %s4474_s19, %s3614_s22  ;;  %p3619_p11 = scmp.lt.s32.totalorder %s4474_s19, %s4533_s14 }
 0x325   : > { %p3620_p12 = scmp.lt.s32.totalorder %s3618_s18, %s3614_s22 }
 0x326   : > { %p3616_p9 = pnand %p3615_p8, %p3788_p5 }
 0x327   : > { %p3621_p13 = por %p3620_p12, %p3619_p11 }
 0x328   : > { %p3617_p10 = pneg %p3616_p9 }
 0x32a   : > { %p3622_p0 = pnand %p3621_p13, %p3617_p10 }
 0x32c   : > { %3625 = shalt.err (!%p3622_p0)
}
 0x32d   : > { %s3673_s27 = smov 128   ;;  %s3674_s17 = smov 8  }
 0x32e   : > { %3355 = dma.vmem_to_hbm [thread:$0]  (%p3788_p5), %s4467_s25, 512, %s4474_s19, %s2548_s24, %s3673_s27, %s3673_s27, %s3674_s17  }
 0x32f PF: > { %p3365_p1 = scmp.ge.s32.totalorder %s3664_s16, 2  ;;  %s2592_s21 = sand.u32 1, %s3652_s29  }
 0x330   : > { %s2593_s22 = scalar_lea.sflag [#allocation3], %s2592_s21 }
 0x331   : > { %p3359_p2 = pnand %p3365_p1, %p3792_p6 }
 0x333   : > { %p3360_p3 = pneg %p3359_p2 }
 0x335   : > { %3643 = dma.done.wait (%p3360_p3), %s2593_s22, 512  }
 0x336   : > { %3645 = vsyncadd (%p3360_p3), %s2593_s22, 4294966784  ;;  %s2602_s1 = scalar_lea.sflag [#allocation5], %s2592_s21 }
 0x337   : > { %3647 = dma.done.wait (%p3360_p3), %s2602_s1, 512  }
 0x338   : > { %3649 = vsyncadd (%p3360_p3), %s2602_s1, 4294966784  ;;  %s4554_s16 = sld [smem:[#allocation9_spill]]  ;;  %s4557_s29 = smov %s3656_s30 }
 0x339   : > { %s4555_s23 = sld [smem:[#allocation8_spill]] }
 0x33a   : > { %s4556_s15 = sld [smem:[#allocation10_spill]] }
 0x33e   : > { %p28_p5 = scmp.ge.s32.totalorder %s4554_s16, 4  }
 0x33f   : > { %s4558_s30 = smov %s4555_s23 }
 0x340   :  { %30 = sbr.rel (!%p28_p5) target bundleno = 8 (0x8), region = 143 }
 0x345   :  { %2607 = vsyncpa [#allocation3], 1 }
 0x346   :  { %2609 = vsyncpa [#allocation3 + $0x1], 1 }
 0x347   :  { %2610 = vsyncpa [#allocation5], 1 }
 0x348   :  { %2612 = vsyncpa [#allocation5 + $0x1], 1 }

</bundles_post_ra>
